<compile_context>
chip_gen: v7x
topology: tpu7x:2x2x1
jax: 0.10.0
libtpu: 0.0.40
codegen_flags: <defaults>
</compile_context>

<pallas_src>
import functools

import jax
import jax.numpy as jnp
from jax.experimental import pallas as pl
from jax.experimental.pallas import tpu as pltpu


def _round_up(x, m):
    return ((x + m - 1) // m) * m


def _sigmoid(x):
    """sigmoid(x) == 0.5 * tanh(0.5 * x) + 0.5 — one EUP op, no divide."""
    half = jnp.asarray(0.5, dtype=x.dtype)
    return half * jnp.tanh(half * x) + half


def _net_kernel(acts_ref, kn_ref, l1w_ref, l1b_ref,
                w1_ref, b1_ref, w2_ref, b2_ref, w3_ref, b3_ref,
                out_ref, *, bf16_act):
    f32 = jnp.float32
    bf16 = jnp.bfloat16
    act_dt = bf16 if bf16_act else f32

    acts = acts_ref[...]                          # (2, TB, D_pad) bf16
    tb = acts.shape[1]
    exe = acts[1]                                 # (TB, D_pad) bf16
    both = acts.reshape(2 * tb, acts.shape[2])    # major-dim merge (layout-free)

    kn = kn_ref[...]                              # (K_pad, D_pad) bf16

    # --- fused knowledge projection: one MXU call for both stu and exe ---
    dn = (((1,), (1,)), ((), ()))                 # contract over D
    proj = _sigmoid(jax.lax.dot_general(both, kn, dn,
                                        preferred_element_type=f32))
    stu_emb = proj[:tb]                           # (TB, K_pad) f32
    k_difficulty = proj[tb:]                      # (TB, K_pad) f32

    # --- e_discrimination = sigmoid(layer1(exe)) * 10  (VPU mul + lane reduce) ---
    e_disc = _sigmoid(
        jnp.sum(exe.astype(f32) * l1w_ref[...], axis=-1, keepdims=True)
        + l1b_ref[0, 0]) * 10.0                   # (TB, 1) f32

    # padded K columns: sigmoid(0) - sigmoid(0) == 0 exactly, and the matching
    # w1_t rows are zero, so padding is inert downstream.
    input_x = (e_disc * (stu_emb - k_difficulty)).astype(bf16)   # (TB, K_pad)

    # --- prednet_full1 -> sigmoid  (drop_1: eval-mode identity) ---
    z1 = jnp.dot(input_x, w1_ref[...], preferred_element_type=f32) + b1_ref[...]
    h1 = _sigmoid(z1.astype(act_dt))              # (TB, 512)

    # --- prednet_full2 -> sigmoid  (drop_2: eval-mode identity) ---
    z2 = jnp.dot(h1.astype(bf16), w2_ref[...],
                 preferred_element_type=f32) + b2_ref[...]
    h2 = _sigmoid(z2.astype(act_dt))              # (TB, 256)

    # --- prednet_full3 (out_features == 1) as VPU mul + lane reduce ---
    logits = jnp.sum(h2.astype(f32) * w3_ref[...], axis=-1) + b3_ref[0, 0]  # (TB,)

    # lane-dense store: batch on the 128-lane axis
    out_ref[...] = _sigmoid(logits)[None, :].astype(out_ref.dtype)          # (1, TB)


def net_forward(params, stu_id, exer_id, kn_emb, tile_b=None):
    """Pallas equivalent of Net.forward. `kn_emb` is unused (as in PyTorch)."""
    del kn_emb  # never read in the original forward()

    kind = ""
    try:
        kind = jax.devices()[0].device_kind.lower()
    except Exception:  # pragma: no cover — defensive only
        pass
    is_v5_or_v6 = ("v5" in kind) or ("v6" in kind)          # 128 MiB VMEM chips
    bf16_act = ("v6" in kind) or ("v7" in kind) or ("7x" in kind)  # bf16 VPU/EUP

    if tile_b is None:
        tile_b = 4096 if is_v5_or_v6 else 2048

    # gather glue in plain JAX; activations streamed to the kernel as bf16
    stu_low = params["student_emb"][stu_id].astype(jnp.bfloat16)    # (B, low_dim)
    exe_low = params["k_difficulty"][exer_id].astype(jnp.bfloat16)  # (B, low_dim)
    B, low_dim = stu_low.shape

    kn = params["knowledge_emb"]                  # (K_pad, D_pad) bf16
    K_pad, D_pad = kn.shape

    # Batch tile: multiple of 128; keep >= 2 grid steps when possible so v7x's
    # two TensorCores both get work (grid axis is "parallel").
    TB = min(_round_up(max(tile_b, 128), 128), _round_up(B, 128))
    n_tiles = -(-B // TB)
    if n_tiles == 1 and TB > 128:
        TB = _round_up((TB + 1) // 2, 128)
        n_tiles = -(-B // TB)
    B_pad = n_tiles * TB

    # Pre-stacked, lane-padded activations: one (2, TB, D_pad) block per grid
    # step removes the old in-kernel concatenate while keeping a single fused
    # MXU projection against the knowledge embedding.
    acts = jnp.stack([stu_low, exe_low], axis=0)                     # (2, B, low_dim)
    acts = jnp.pad(acts, ((0, 0), (0, B_pad - B), (0, D_pad - low_dim)))

    l1w = params["layer1_w"]            # (1, D_pad)   f32
    l1b = params["layer1_b"]            # (1, 1)       f32 -> SMEM
    w1 = params["w1_t"]                 # (K_pad, 512) bf16
    b1 = params["b1"]                   # (1, 512)     f32
    w2 = params["w2_t"]                 # (512, 256)   bf16
    b2 = params["b2"]                   # (1, 256)     f32
    w3 = params["w3"]                   # (1, 256)     f32
    b3 = params["b3"]                   # (1, 1)       f32 -> SMEM

    def resident(shape):
        nd = len(shape)
        return pl.BlockSpec(shape, lambda i, _nd=nd: (0,) * _nd)

    smem_spec = pl.BlockSpec(memory_space=pltpu.MemorySpace.SMEM)

    in_specs = [
        pl.BlockSpec((2, TB, D_pad), lambda i: (0, i, 0)),   # stacked activations
        resident(kn.shape),                                  # knowledge emb
        resident(l1w.shape),                                 # layer1 weight row
        smem_spec,                                           # layer1 bias
        resident(w1.shape),                                  # prednet_full1 W^T
        resident(b1.shape),
        resident(w2.shape),                                  # prednet_full2 W^T
        resident(b2.shape),
        resident(w3.shape),                                  # prednet_full3 W row
        smem_spec,                                           # prednet_full3 bias
    ]
    out_specs = pl.BlockSpec((1, TB), lambda i: (0, i))

    # Raise the scoped VMEM limit only when a >2048 tile actually needs it;
    # stay well inside v7x's 64 MiB physical VMEM.
    vmem_limit = None
    if TB > 2048:
        vmem_limit = (96 if is_v5_or_v6 else 48) * 1024 * 1024

    kernel = functools.partial(_net_kernel, bf16_act=bf16_act)

    out = pl.pallas_call(
        kernel,
        grid=(n_tiles,),
        in_specs=in_specs,
        out_specs=out_specs,
        out_shape=jax.ShapeDtypeStruct((1, B_pad), jnp.float32),
        compiler_params=pltpu.CompilerParams(
            dimension_semantics=("parallel",),
            vmem_limit_bytes=vmem_limit),
    )(acts, kn, l1w, l1b, w1, b1, w2, b2, w3, b3)

    return out[0, :B].reshape(B, 1)


def init_params(key, student_n, exer_n, knowledge_n, low_dim):
    """Deterministic xavier-normal weights (matches the module's init scheme);
    biases are zero (synthetic parameters, not a checkpoint load).

    K (knowledge_n) and D (low_dim) are zero-padded to lane width (128) in the
    kernel-facing weights; padded rows/cols of knowledge_emb and w1_t MUST stay
    exactly zero (a checkpoint loader would need to re-zero them).  Embedding
    tables keep their natural (N, low_dim) f32 shape; padding happens in the
    wrapper.  Linear weights are stored pre-transposed as [in, out].
    """
    D_pad = _round_up(low_dim, 128)
    K_pad = _round_up(knowledge_n, 128)
    len1, len2 = 512, 256
    k = jax.random.split(key, 7)

    def xavier(rng, shape):
        fan_out, fan_in = shape
        std = (2.0 / (fan_in + fan_out)) ** 0.5
        return std * jax.random.normal(rng, shape, dtype=jnp.float32)

    def pad2(a, rows, cols):
        return jnp.pad(a, ((0, rows - a.shape[0]), (0, cols - a.shape[1])))

    params = {
        # embedding tables at natural shape (gathered + padded in the wrapper)
        "student_emb": xavier(k[0], (student_n, low_dim)),
        "k_difficulty": xavier(k[2], (exer_n, low_dim)),
        # knowledge embedding, (K_pad, D_pad), padding rows/cols exactly zero
        "knowledge_emb": pad2(xavier(k[1], (knowledge_n, low_dim)),
                              K_pad, D_pad).astype(jnp.bfloat16),
        # layer1: Linear(low_dim, 1) as a broadcast row + SMEM scalar bias
        "layer1_w": pad2(xavier(k[6], (1, low_dim)), 1, D_pad),     # (1, D_pad)
        "layer1_b": jnp.zeros((1, 1), jnp.float32),
        # prednet_full1: (512, K) -> transposed + K zero-padded, bf16
        "w1_t": pad2(xavier(k[3], (len1, knowledge_n)).T,
                     K_pad, len1).astype(jnp.bfloat16),             # (K_pad, 512)
        "b1": jnp.zeros((1, len1), jnp.float32),
        # prednet_full2: (256, 512) -> transposed, bf16
        "w2_t": xavier(k[4], (len2, len1)).T.astype(jnp.bfloat16),  # (512, 256)
        "b2": jnp.zeros((1, len2), jnp.float32),
        # prednet_full3: (1, 256) kept as a row for the VPU reduction
        "w3": xavier(k[5], (1, len2)),                              # (1, 256)
        "b3": jnp.zeros((1, 1), jnp.float32),
    }
    return params


if __name__ == "__main__":
    student_n, exer_n, knowledge_n, low_dim = 20, 30, 32, 16
    B = 8

    key = jax.random.PRNGKey(0)
    pkey, k_stu, k_exe = jax.random.split(key, 3)
    params = init_params(pkey, student_n, exer_n, knowledge_n, low_dim)

    stu_id = jax.random.randint(k_stu, (B,), 0, student_n, dtype=jnp.int32)
    exer_id = jax.random.randint(k_exe, (B,), 0, exer_n, dtype=jnp.int32)
    # kn_emb is an argument of forward() but never used by it
    kn_emb = jnp.zeros((B, knowledge_n), dtype=jnp.float32)

    out = net_forward(params, stu_id, exer_id, kn_emb)
    out = jax.block_until_ready(out)
    assert out.shape == (B, 1) and out.dtype == jnp.float32
    assert bool(jnp.all((out > 0.0) & (out < 1.0)))
    print("KERNEL_OK")
</pallas_src>

<mosaic_0001>
module attributes {stable_mosaic.version = 11 : i64} {
  func.func @_net_kernel(%arg0: i32, %arg1: memref<2x128x128xbf16, #tpu.memory_space<vmem>>, %arg2: memref<128x128xbf16, #tpu.memory_space<vmem>>, %arg3: memref<1x128xf32, #tpu.memory_space<vmem>>, %arg4: memref<1x1xf32, #tpu.memory_space<smem>>, %arg5: memref<128x512xbf16, #tpu.memory_space<vmem>>, %arg6: memref<1x512xf32, #tpu.memory_space<vmem>>, %arg7: memref<512x256xbf16, #tpu.memory_space<vmem>>, %arg8: memref<1x256xf32, #tpu.memory_space<vmem>>, %arg9: memref<1x256xf32, #tpu.memory_space<vmem>>, %arg10: memref<1x1xf32, #tpu.memory_space<smem>>, %arg11: memref<1x128xf32, #tpu.memory_space<vmem>>) attributes {dimension_semantics = [#tpu.dimension_semantics<parallel>], iteration_bounds = array<i64: 1>, scalar_prefetch = 0 : i64, scratch_operands = 0 : i64, tpu.core_type = #tpu.core_type<tc>, window_params = [{transform_indices = @transform_0, window_bounds = array<i64: 2, 128, 128>}, {pipeline_mode = #tpu.pipeline_mode<synchronous>, transform_indices = @transform_1, window_bounds = array<i64: 128, 128>}, {pipeline_mode = #tpu.pipeline_mode<synchronous>, transform_indices = @transform_2, window_bounds = array<i64: 1, 128>}, {transform_indices = @transform_3, window_bounds = array<i64: 1, 1>}, {pipeline_mode = #tpu.pipeline_mode<synchronous>, transform_indices = @transform_4, window_bounds = array<i64: 128, 512>}, {pipeline_mode = #tpu.pipeline_mode<synchronous>, transform_indices = @transform_5, window_bounds = array<i64: 1, 512>}, {pipeline_mode = #tpu.pipeline_mode<synchronous>, transform_indices = @transform_6, window_bounds = array<i64: 512, 256>}, {pipeline_mode = #tpu.pipeline_mode<synchronous>, transform_indices = @transform_7, window_bounds = array<i64: 1, 256>}, {pipeline_mode = #tpu.pipeline_mode<synchronous>, transform_indices = @transform_8, window_bounds = array<i64: 1, 256>}, {transform_indices = @transform_9, window_bounds = array<i64: 1, 1>}, {transform_indices = @transform_10, window_bounds = array<i64: 1, 128>}]} {
    %c0 = arith.constant 0 : index
    %c0_0 = arith.constant 0 : index
    %c0_1 = arith.constant 0 : index
    %0 = vector.load %arg1[%c0, %c0_0, %c0_1] : memref<2x128x128xbf16, #tpu.memory_space<vmem>>, vector<2x128x128xbf16>
    %1 = vector.extract_strided_slice %0 {offsets = [1, 0, 0], sizes = [1, 128, 128], strides = [1, 1, 1]} : vector<2x128x128xbf16> to vector<1x128x128xbf16>
    %2 = vector.shape_cast %1 : vector<1x128x128xbf16> to vector<128x128xbf16>
    %3 = vector.shape_cast %0 : vector<2x128x128xbf16> to vector<256x128xbf16>
    %c0_2 = arith.constant 0 : index
    %c0_3 = arith.constant 0 : index
    %4 = vector.load %arg2[%c0_2, %c0_3] : memref<128x128xbf16, #tpu.memory_space<vmem>>, vector<128x128xbf16>
    %cst = arith.constant dense<0.000000e+00> : vector<256x128xf32>
    %5 = tpu.matmul %3, %4, %cst {dimension_numbers = #tpu.dot_dimension_numbers<[1], [1], [0], [0], [0, 0, 1, 0], [], []>} : vector<256x128xbf16>, vector<128x128xbf16>, vector<256x128xf32> -> vector<256x128xf32>
    %cst_4 = arith.constant 5.000000e-01 : f32
    %6 = vector.broadcast %cst_4 : f32 to vector<256x128xf32>
    %7 = arith.mulf %6, %5 : vector<256x128xf32>
    %8 = math.tanh %7 : vector<256x128xf32>
    %cst_5 = arith.constant 5.000000e-01 : f32
    %9 = vector.broadcast %cst_5 : f32 to vector<256x128xf32>
    %10 = arith.mulf %9, %8 : vector<256x128xf32>
    %cst_6 = arith.constant 5.000000e-01 : f32
    %11 = vector.broadcast %cst_6 : f32 to vector<256x128xf32>
    %12 = arith.addf %10, %11 : vector<256x128xf32>
    %13 = vector.extract_strided_slice %12 {offsets = [0, 0], sizes = [128, 128], strides = [1, 1]} : vector<256x128xf32> to vector<128x128xf32>
    %14 = vector.extract_strided_slice %12 {offsets = [128, 0], sizes = [128, 128], strides = [1, 1]} : vector<256x128xf32> to vector<128x128xf32>
    %15 = arith.extf %2 : vector<128x128xbf16> to vector<128x128xf32>
    %c0_7 = arith.constant 0 : index
    %c0_8 = arith.constant 0 : index
    %16 = vector.load %arg3[%c0_7, %c0_8] : memref<1x128xf32, #tpu.memory_space<vmem>>, vector<1x128xf32>
    %17 = vector.broadcast %16 : vector<1x128xf32> to vector<128x128xf32>
    %18 = arith.mulf %15, %17 : vector<128x128xf32>
    %cst_9 = arith.constant dense<0.000000e+00> : vector<128xf32>
    %19 = vector.multi_reduction <add>, %18, %cst_9 [1] : vector<128x128xf32> to vector<128xf32>
    %20 = vector.shape_cast %19 : vector<128xf32> to vector<128x1xf32>
    %c0_10 = arith.constant 0 : index
    %c0_11 = arith.constant 0 : index
    %21 = memref.load %arg4[%c0_10, %c0_11] : memref<1x1xf32, #tpu.memory_space<smem>>
    %22 = vector.broadcast %21 : f32 to vector<128x1xf32>
    %23 = arith.addf %20, %22 : vector<128x1xf32>
    %cst_12 = arith.constant 5.000000e-01 : f32
    %24 = vector.broadcast %cst_12 : f32 to vector<128x1xf32>
    %25 = arith.mulf %24, %23 : vector<128x1xf32>
    %26 = math.tanh %25 : vector<128x1xf32>
    %cst_13 = arith.constant 5.000000e-01 : f32
    %27 = vector.broadcast %cst_13 : f32 to vector<128x1xf32>
    %28 = arith.mulf %27, %26 : vector<128x1xf32>
    %cst_14 = arith.constant 5.000000e-01 : f32
    %29 = vector.broadcast %cst_14 : f32 to vector<128x1xf32>
    %30 = arith.addf %28, %29 : vector<128x1xf32>
    %cst_15 = arith.constant 1.000000e+01 : f32
    %31 = vector.broadcast %cst_15 : f32 to vector<128x1xf32>
    %32 = arith.mulf %30, %31 : vector<128x1xf32>
    %33 = arith.subf %13, %14 : vector<128x128xf32>
    %34 = vector.broadcast %32 : vector<128x1xf32> to vector<128x128xf32>
    %35 = arith.mulf %34, %33 : vector<128x128xf32>
    %36 = arith.truncf %35 : vector<128x128xf32> to vector<128x128xbf16>
    %c0_16 = arith.constant 0 : index
    %c0_17 = arith.constant 0 : index
    %37 = vector.load %arg5[%c0_16, %c0_17] : memref<128x512xbf16, #tpu.memory_space<vmem>>, vector<128x512xbf16>
    %cst_18 = arith.constant dense<0.000000e+00> : vector<128x512xf32>
    %38 = tpu.matmul %36, %37, %cst_18 {dimension_numbers = #tpu.dot_dimension_numbers<[1], [0], [0], [1], [0, 0, 1, 1], [], []>} : vector<128x128xbf16>, vector<128x512xbf16>, vector<128x512xf32> -> vector<128x512xf32>
    %c0_19 = arith.constant 0 : index
    %c0_20 = arith.constant 0 : index
    %39 = vector.load %arg6[%c0_19, %c0_20] : memref<1x512xf32, #tpu.memory_space<vmem>>, vector<1x512xf32>
    %40 = vector.broadcast %39 : vector<1x512xf32> to vector<128x512xf32>
    %41 = arith.addf %38, %40 : vector<128x512xf32>
    %cst_21 = arith.constant 5.000000e-01 : f32
    %42 = vector.broadcast %cst_21 : f32 to vector<128x512xf32>
    %43 = arith.mulf %42, %41 : vector<128x512xf32>
    %44 = math.tanh %43 : vector<128x512xf32>
    %cst_22 = arith.constant 5.000000e-01 : f32
    %45 = vector.broadcast %cst_22 : f32 to vector<128x512xf32>
    %46 = arith.mulf %45, %44 : vector<128x512xf32>
    %cst_23 = arith.constant 5.000000e-01 : f32
    %47 = vector.broadcast %cst_23 : f32 to vector<128x512xf32>
    %48 = arith.addf %46, %47 : vector<128x512xf32>
    %49 = arith.truncf %48 : vector<128x512xf32> to vector<128x512xbf16>
    %c0_24 = arith.constant 0 : index
    %c0_25 = arith.constant 0 : index
    %50 = vector.load %arg7[%c0_24, %c0_25] : memref<512x256xbf16, #tpu.memory_space<vmem>>, vector<512x256xbf16>
    %cst_26 = arith.constant dense<0.000000e+00> : vector<128x256xf32>
    %51 = tpu.matmul %49, %50, %cst_26 {dimension_numbers = #tpu.dot_dimension_numbers<[1], [0], [0], [1], [0, 0, 1, 1], [], []>} : vector<128x512xbf16>, vector<512x256xbf16>, vector<128x256xf32> -> vector<128x256xf32>
    %c0_27 = arith.constant 0 : index
    %c0_28 = arith.constant 0 : index
    %52 = vector.load %arg8[%c0_27, %c0_28] : memref<1x256xf32, #tpu.memory_space<vmem>>, vector<1x256xf32>
    %53 = vector.broadcast %52 : vector<1x256xf32> to vector<128x256xf32>
    %54 = arith.addf %51, %53 : vector<128x256xf32>
    %cst_29 = arith.constant 5.000000e-01 : f32
    %55 = vector.broadcast %cst_29 : f32 to vector<128x256xf32>
    %56 = arith.mulf %55, %54 : vector<128x256xf32>
    %57 = math.tanh %56 : vector<128x256xf32>
    %cst_30 = arith.constant 5.000000e-01 : f32
    %58 = vector.broadcast %cst_30 : f32 to vector<128x256xf32>
    %59 = arith.mulf %58, %57 : vector<128x256xf32>
    %cst_31 = arith.constant 5.000000e-01 : f32
    %60 = vector.broadcast %cst_31 : f32 to vector<128x256xf32>
    %61 = arith.addf %59, %60 : vector<128x256xf32>
    %c0_32 = arith.constant 0 : index
    %c0_33 = arith.constant 0 : index
    %62 = vector.load %arg9[%c0_32, %c0_33] : memref<1x256xf32, #tpu.memory_space<vmem>>, vector<1x256xf32>
    %63 = vector.broadcast %62 : vector<1x256xf32> to vector<128x256xf32>
    %64 = arith.mulf %61, %63 : vector<128x256xf32>
    %cst_34 = arith.constant dense<0.000000e+00> : vector<128xf32>
    %65 = vector.multi_reduction <add>, %64, %cst_34 [1] : vector<128x256xf32> to vector<128xf32>
    %c0_35 = arith.constant 0 : index
    %c0_36 = arith.constant 0 : index
    %66 = memref.load %arg10[%c0_35, %c0_36] : memref<1x1xf32, #tpu.memory_space<smem>>
    %67 = vector.broadcast %66 : f32 to vector<128xf32>
    %68 = arith.addf %65, %67 : vector<128xf32>
    %cst_37 = arith.constant 5.000000e-01 : f32
    %69 = vector.broadcast %cst_37 : f32 to vector<128xf32>
    %70 = arith.mulf %69, %68 : vector<128xf32>
    %71 = math.tanh %70 : vector<128xf32>
    %cst_38 = arith.constant 5.000000e-01 : f32
    %72 = vector.broadcast %cst_38 : f32 to vector<128xf32>
    %73 = arith.mulf %72, %71 : vector<128xf32>
    %cst_39 = arith.constant 5.000000e-01 : f32
    %74 = vector.broadcast %cst_39 : f32 to vector<128xf32>
    %75 = arith.addf %73, %74 : vector<128xf32>
    %76 = vector.shape_cast %75 : vector<128xf32> to vector<1x128xf32>
    %c0_40 = arith.constant 0 : index
    %c0_41 = arith.constant 0 : index
    %77 = vector.load %arg11[%c0_40, %c0_41] : memref<1x128xf32, #tpu.memory_space<vmem>>, vector<1x128xf32>
    tpu.vector_store %arg11[%c0_40, %c0_41], %76 {strides = array<i32>} : memref<1x128xf32, #tpu.memory_space<vmem>>, vector<1x128xf32>,
    return
  }
  func.func @transform_0(%arg0: i32) -> (i32, i32, i32) {
    %c0_i32 = arith.constant 0 : i32
    %c0_i32_0 = arith.constant 0 : i32
    %c0_i32_1 = arith.constant 0 : i32
    return %c0_i32, %arg0, %c0_i32_0 : i32, i32, i32
  }
  func.func @transform_1(%arg0: i32) -> (i32, i32) {
    %c0_i32 = arith.constant 0 : i32
    %c0_i32_0 = arith.constant 0 : i32
    %c0_i32_1 = arith.constant 0 : i32
    return %c0_i32, %c0_i32_0 : i32, i32
  }
  func.func @transform_2(%arg0: i32) -> (i32, i32) {
    %c0_i32 = arith.constant 0 : i32
    %c0_i32_0 = arith.constant 0 : i32
    %c0_i32_1 = arith.constant 0 : i32
    return %c0_i32, %c0_i32_0 : i32, i32
  }
  func.func @transform_3(%arg0: i32) -> (i32, i32) {
    %c0_i32 = arith.constant 0 : i32
    %c0_i32_0 = arith.constant 0 : i32
    %c0_i32_1 = arith.constant 0 : i32
    return %c0_i32, %c0_i32_0 : i32, i32
  }
  func.func @transform_4(%arg0: i32) -> (i32, i32) {
    %c0_i32 = arith.constant 0 : i32
    %c0_i32_0 = arith.constant 0 : i32
    %c0_i32_1 = arith.constant 0 : i32
    return %c0_i32, %c0_i32_0 : i32, i32
  }
  func.func @transform_5(%arg0: i32) -> (i32, i32) {
    %c0_i32 = arith.constant 0 : i32
    %c0_i32_0 = arith.constant 0 : i32
    %c0_i32_1 = arith.constant 0 : i32
    return %c0_i32, %c0_i32_0 : i32, i32
  }
  func.func @transform_6(%arg0: i32) -> (i32, i32) {
    %c0_i32 = arith.constant 0 : i32
    %c0_i32_0 = arith.constant 0 : i32
    %c0_i32_1 = arith.constant 0 : i32
    return %c0_i32, %c0_i32_0 : i32, i32
  }
  func.func @transform_7(%arg0: i32) -> (i32, i32) {
    %c0_i32 = arith.constant 0 : i32
    %c0_i32_0 = arith.constant 0 : i32
    %c0_i32_1 = arith.constant 0 : i32
    return %c0_i32, %c0_i32_0 : i32, i32
  }
  func.func @transform_8(%arg0: i32) -> (i32, i32) {
    %c0_i32 = arith.constant 0 : i32
    %c0_i32_0 = arith.constant 0 : i32
    %c0_i32_1 = arith.constant 0 : i32
    return %c0_i32, %c0_i32_0 : i32, i32
  }
  func.func @transform_9(%arg0: i32) -> (i32, i32) {
    %c0_i32 = arith.constant 0 : i32
    %c0_i32_0 = arith.constant 0 : i32
    %c0_i32_1 = arith.constant 0 : i32
    return %c0_i32, %c0_i32_0 : i32, i32
  }
  func.func @transform_10(%arg0: i32) -> (i32, i32) {
    %c0_i32 = arith.constant 0 : i32
    %c0_i32_0 = arith.constant 0 : i32
    return %c0_i32, %arg0 : i32, i32
  }
}

</mosaic_0001>

<bundles_post_ra>
// kernel: tpu_custom_call.1
= control target key start
LH: loop header
LB: loop body
LE: loop exit
PB: predicated region body
PF: predicated region fallthrough
CT: control target
= control target key end

     0   :  { %17 = vsyncpa [#allocation5], 0  ;;  %s4255_s0 = inlined_call_operand.hbm [shape: bf16[2,128,128], index: 0, kind: input, shape index: {}]   ;;  %s4256_s1 = inlined_call_operand.hbm [shape: bf16[128,128], index: 1, kind: input, shape index: {}]   ;;  %s4257_s2 = inlined_call_operand.vmem [shape: f32[1,128], index: 2, kind: input, shape index: {}]   ;;  %s4258_s3 = inlined_call_operand.<no memory space> [shape: f32[1,1], index: 3, kind: input, shape index: {}]   ;;  %s4259_s4 = inlined_call_operand.hbm [shape: bf16[128,512], index: 4, kind: input, shape index: {}]   ;;  %s4260_s5 = inlined_call_operand.vmem [shape: f32[1,512], index: 5, kind: input, shape index: {}]   ;;  %s4261_s6 = inlined_call_operand.hbm [shape: bf16[512,256], index: 6, kind: input, shape index: {}]   ;;  %s4262_s7 = inlined_call_operand.vmem [shape: f32[1,256], index: 7, kind: input, shape index: {}]   ;;  %s4263_s8 = inlined_call_operand.vmem [shape: f32[1,256], index: 8, kind: input, shape index: {}]   ;;  %s4264_s9 = inlined_call_operand.<no memory space> [shape: f32[1,1], index: 9, kind: input, shape index: {}]   ;;  %s4265_s10 = inlined_call_operand.hbm [shape: f32[1,128], index: 10, kind: output, shape index: {}]  }
   0x1   :  { %18 = vsyncpa [#allocation8], 0 }
   0x2   :  { %19 = vsyncpa [#allocation11], 0 }
   0x3   :  { %20 = vsyncpa [#allocation6], 0  ;;  %s3497_s13 = smov [#allocation7]   ;;  %s3498_s15 = smov [#allocation4]  }
   0x4   :  { %s38_s14 = sshll.u32 %s3497_s13, 4  ;;  %s26_s16 = sshll.u32 %s3498_s15, 4  ;;  %s39_s14 = int_to_ptr.vmem [resolvable:$true] %s38_s14  ;;  %s3564_s16 = int_to_ptr.vmem [resolvable:$true] %s26_s16 }
   0x5   :  { %s3379_s19 = scalar_lea.hbm %s4256_s1, 1024 }
   0x6   :  { %p3380_p0 = scmp.ne.s32.totalorder %s4256_s1, %s3379_s19  ;;  %p3383_p1 = scmp.lt.u32.totalorder %s3379_s19, %s4256_s1 }
   0x8   :  { %p3385_p2 = pnand %p3383_p1, %p3380_p0 }
   0xa   :  { %3388 = shalt.err (!%p3385_p2)
}
   0xb   :  { %s3389_s24 = scalar_lea.vmem %s39_s14, 1024  ;;  %p3394_p4 = scmp.lt.s32.totalorder %s39_s14, %s39_s14 }
   0xc   :  { %p3390_p3 = scmp.ne.s32.totalorder %s39_s14, %s3389_s24  ;;  %p3395_p5 = scmp.lt.s32.totalorder %s3389_s24, %s3389_s24 }
   0xe   :  { %p3396_p6 = por %p3395_p5, %p3394_p4 }
  0x10   :  { %p3397_p7 = pnand %p3396_p6, %p3390_p3 }
  0x12   :  { %3400 = shalt.err (!%p3397_p7)
}
  0x13   :  { %s3499_s25 = smov 64   ;;  %s3500_s26 = smov 4  }
  0x14   :  { %44 = dma.hbm_to_vmem [thread:$0]  %s4256_s1, 1024, %s39_s14, [#allocation8], %s3499_s25, %s3499_s25, %s3500_s26  }
  0x15   :  { %s3401_s11 = scalar_lea.hbm %s4255_s0, 2048 }
  0x16   :  { %p3402_p8 = scmp.ne.s32.totalorder %s4255_s0, %s3401_s11  ;;  %p3405_p9 = scmp.lt.u32.totalorder %s3401_s11, %s4255_s0 }
  0x18   :  { %p3407_p10 = pnand %p3405_p9, %p3402_p8 }
  0x1a   :  { %3410 = shalt.err (!%p3407_p10)
}
  0x1b   :  { %s3411_s18 = scalar_lea.vmem %s3564_s16, 2048  ;;  %p3416_p12 = scmp.lt.s32.totalorder %s3564_s16, %s3564_s16 }
  0x1c   :  { %p3412_p11 = scmp.ne.s32.totalorder %s3564_s16, %s3411_s18  ;;  %p3417_p13 = scmp.lt.s32.totalorder %s3411_s18, %s3411_s18 }
  0x1e   :  { %p3418_p0 = por %p3417_p13, %p3416_p12 }
  0x20   :  { %p3419_p1 = pnand %p3418_p0, %p3412_p11 }
  0x22   :  { %3422 = shalt.err (!%p3419_p1)
}
  0x23   :  { %32 = dma.hbm_to_vmem [thread:$0]  %s4255_s0, 2048, %s3564_s16, [#allocation5], %s3499_s25, %s3499_s25, %s3500_s26  }
  0x24   :  { %s3501_s19 = smov [#allocation9]   ;;  %s3423_s23 = scalar_lea.hbm %s4259_s4, 4096 }
  0x25   :  { %s54_s20 = sshll.u32 %s3501_s19, 4  ;;  %p3424_p2 = scmp.ne.s32.totalorder %s4259_s4, %s3423_s23  ;;  %s55_s20 = int_to_ptr.vmem [resolvable:$true] %s54_s20 }
  0x26   :  { %p3427_p3 = scmp.lt.u32.totalorder %s3423_s23, %s4259_s4 }
  0x28   :  { %p3429_p4 = pnand %p3427_p3, %p3424_p2 }
  0x2a   :  { %3432 = shalt.err (!%p3429_p4)
}
  0x2b   :  { %s3433_s30 = scalar_lea.vmem %s55_s20, 4096  ;;  %p3438_p6 = scmp.lt.s32.totalorder %s55_s20, %s55_s20 }
  0x2c   :  { %p3434_p5 = scmp.ne.s32.totalorder %s55_s20, %s3433_s30  ;;  %p3439_p7 = scmp.lt.s32.totalorder %s3433_s30, %s3433_s30 }
  0x2e   :  { %p3440_p8 = por %p3439_p7, %p3438_p6 }
  0x30   :  { %p3441_p9 = pnand %p3440_p8, %p3434_p5 }
  0x32   :  { %3444 = shalt.err (!%p3441_p9)
}
  0x33   :  { %s3502_s0 = smov 256   ;;  %s3503_s16 = smov 16  }
  0x34   :  { %60 = dma.hbm_to_vmem [thread:$0]  %s4259_s4, 4096, %s55_s20, [#allocation8], %s3502_s0, %s3502_s0, %s3503_s16  }
  0x35   :  { %s3504_s11 = smov [#allocation10]   ;;  %s3445_s17 = scalar_lea.hbm %s4261_s6, 8192 }
  0x36   :  { %s68_s12 = sshll.u32 %s3504_s11, 4  ;;  %p3446_p10 = scmp.ne.s32.totalorder %s4261_s6, %s3445_s17  ;;  %s69_s12 = int_to_ptr.vmem [resolvable:$true] %s68_s12 }
  0x37   :  { %p3449_p11 = scmp.lt.u32.totalorder %s3445_s17, %s4261_s6 }
  0x39   :  { %p3451_p12 = pnand %p3449_p11, %p3446_p10 }
  0x3b   :  { %3454 = shalt.err (!%p3451_p12)
}
  0x3c   :  { %s3455_s21 = scalar_lea.vmem %s69_s12, 8192  ;;  %p3460_p0 = scmp.lt.s32.totalorder %s69_s12, %s69_s12 }
  0x3d   :  { %p3456_p13 = scmp.ne.s32.totalorder %s69_s12, %s3455_s21  ;;  %p3461_p1 = scmp.lt.s32.totalorder %s3455_s21, %s3455_s21 }
  0x3f   :  { %p3462_p2 = por %p3461_p1, %p3460_p0 }
  0x41   :  { %p3463_p3 = pnand %p3462_p2, %p3456_p13 }
  0x43   :  { %3466 = shalt.err (!%p3463_p3)
}
  0x44   :  { %s3505_s4 = smov 128   ;;  %s3506_s20 = smov 8  }
  0x45   :  { %74 = dma.hbm_to_vmem [thread:$0]  %s4261_s6, 8192, %s69_s12, [#allocation11], %s3505_s4, %s3505_s4, %s3506_s20  }
  0x46   :  { %3489 = dma.done.wait [#allocation5], 2048  }
  0x47   :  { %3490 = vsyncadd [#allocation5], 4294965248 }
  0x48   :  { %3491 = dma.done.wait [#allocation8], 5120  }
  0x49   :  { %3492 = vsyncadd [#allocation8], 4294962176 }
  0x4a   :  { %3493 = dma.done.wait [#allocation11], 8192  }
  0x4b   :  { %3494 = vsyncadd [#allocation11], 4294959104  ;;  %v2883_v0 = vld [vmem:[#allocation7] sm:$0xff]   ;;  %v2884_v1 = vld [vmem:[#allocation7 + $0x8] sm:$0xff]   ;;  %vm2463_vm0 = vcmask 130112   ;;  %vm2470_vm1 = vcmask 195712  }
  0x4c   :  { %2727 = vmatprep.subr.bf16.mxu0 %v2883_v0  ;;  %v2885_v2 = vld [vmem:[#allocation7 + $0x10] sm:$0xff]   ;;  %v2891_v3 = vld [vmem:[#allocation4] sm:$0xff]   ;;  %v2886_v4 = vld [vmem:[#allocation7 + $0x18] sm:$0xff]   ;;  %vm2477_vm2 = vcmask 261312   ;;  %vm2484_vm3 = vcmask 326912   ;;  %vm2491_vm4 = vcmask 392512  }
  0x4d   :  { %2728 = vmatpush3.bf16.xpose.msra.mxu0 %v2883_v0  ;;  %2743 = vmatprep.mubr.bf16.mxu0 %v2891_v3  ;;  %v3619_v5 = vld [vmem:[#allocation4 + $0x40] sm:$0xff]   ;;  %v3621_v6 = vld [vmem:[#allocation4 + $0x48] sm:$0xff]   ;;  %v3624_v8 = vld [vmem:[#allocation4 + $0x50] sm:$0xff]   ;;  %vm2498_vm5 = vcmask 458112   ;;  %vm2505_vm6 = vcmask 523712   ;;  %vm2512_vm7 = vcmask 589312  }
  0x4e   :  { %2729 = vmatprep.subr.bf16.mxu0 %v2884_v1  ;;  %v575_v7 = vunpack.c.l.bf16 %v3619_v5  ;;  %v2606_v9 = vld [vmem:[%s4257_s2] ss:$0 sm:$0xff]  ;;  %v577_v10 = vunpack.c.l.bf16 %v3621_v6  ;;  %v576_v12 = vunpack.c.h.bf16 %v3619_v5  ;;  %v578_v14 = vunpack.c.h.bf16 %v3621_v6  ;;  %v3633_v18 = vld [vmem:[#allocation4 + $0x58] sm:$0xff]   ;;  %v2888_v28 = vld [vmem:[#allocation7 + $0x28] sm:$0xff]  }
  0x4f   :  { %v579_v16 = vunpack.c.l.bf16 %v3624_v8  ;;  %v2887_v17 = vld [vmem:[#allocation7 + $0x20] sm:$0xff]   ;;  %v580_v20 = vunpack.c.h.bf16 %v3624_v8  ;;  %v581_v22 = vunpack.c.l.bf16 %v3633_v18  ;;  %v582_v25 = vunpack.c.h.bf16 %v3633_v18  ;;  %v120_v29 = vld [vmem:[#allocation4 + $0x68] sm:$0xff]   ;;  %v122_v34 = vld [vmem:[#allocation4 + $0x70] sm:$0xff]  }
  0x50   :  { %v598_v11 = vmul.f32 %v2606_v9, %v575_v7  ;;  %v600_v13 = vmul.f32 %v2606_v9, %v577_v10  ;;  %v599_v15 = vmul.f32 %v2606_v9, %v576_v12  ;;  %v601_v19 = vmul.f32 %v2606_v9, %v578_v14  ;;  %v3637_v23 = vld [vmem:[#allocation4 + $0x60] sm:$0xff]   ;;  %v2889_v39 = vld [vmem:[#allocation7 + $0x30] sm:$0xff]   ;;  %v124_v40 = vld [vmem:[#allocation4 + $0x78] sm:$0xff]  }
  0x51   :  { %v602_v21 = vmul.f32 %v2606_v9, %v579_v16  ;;  %v603_v24 = vmul.f32 %v2606_v9, %v580_v20  ;;  %v604_v26 = vmul.f32 %v2606_v9, %v581_v22  ;;  %v583_v27 = vunpack.c.l.bf16 %v3637_v23  ;;  %v2890_v48 = vld [vmem:[#allocation7 + $0x38] sm:$0xff]   ;;  %v2892_v50 = vld [vmem:[#allocation4 + $0x8] sm:$0xff]   ;;  %v2893_v51 = vld [vmem:[#allocation4 + $0x10] sm:$0xff]  }
  0x52   :  { %614 = vadd.xlane.f32.xlu0 %v598_v11  ;;  %618 = vadd.xlane.f32.xlu1 %v600_v13  ;;  %v605_v30 = vmul.f32 %v2606_v9, %v582_v25  ;;  %v584_v31 = vunpack.c.h.bf16 %v3637_v23  ;;  %v585_v33 = vunpack.c.l.bf16 %v120_v29  ;;  %v586_v36 = vunpack.c.h.bf16 %v120_v29  ;;  %v2894_v52 = vld [vmem:[#allocation4 + $0x18] sm:$0xff]   ;;  %v2895_v53 = vld [vmem:[#allocation4 + $0x20] sm:$0xff]   ;;  %v2896_v54 = vld [vmem:[#allocation4 + $0x28] sm:$0xff]  }
  0x53   :  { %v606_v32 = vmul.f32 %v2606_v9, %v583_v27  ;;  %v587_v38 = vunpack.c.l.bf16 %v122_v34  ;;  %v588_v42 = vunpack.c.h.bf16 %v122_v34  ;;  %v589_v44 = vunpack.c.l.bf16 %v124_v40  ;;  %v2897_v55 = vld [vmem:[#allocation4 + $0x30] sm:$0xff]   ;;  %v2898_v56 = vld [vmem:[#allocation4 + $0x38] sm:$0xff]  }
  0x54   :  { %v607_v35 = vmul.f32 %v2606_v9, %v584_v31  ;;  %v608_v37 = vmul.f32 %v2606_v9, %v585_v33  ;;  %v609_v41 = vmul.f32 %v2606_v9, %v586_v36  ;;  %v590_v46 = vunpack.c.h.bf16 %v124_v40  ;;  %v2907_v57 = vld [vmem:[#allocation9 + $0x4] ss:$16 sps:$4 sm:$0xff]   ;;  %v2909_v58 = vld [vmem:[#allocation9] ss:$16 sps:$4 sm:$0xff]   ;;  %v2933_v10 = vld [vmem:[#allocation9 + $0xc] ss:$16 sps:$4 sm:$0xff]  }
  0x55   :  { %2730 = vmatpush3.bf16.xpose.msra.mxu0 %v2884_v1  ;;  %v610_v43 = vmul.f32 %v2606_v9, %v587_v38  ;;  %v611_v45 = vmul.f32 %v2606_v9, %v588_v42  ;;  %v612_v47 = vmul.f32 %v2606_v9, %v589_v44  ;;  %998 = vmatprep.subr.bf16.mxu1 %v2907_v57  ;;  %v2910_v59 = vld [vmem:[#allocation9 + $0x24] ss:$16 sps:$4 sm:$0xff]   ;;  %v2912_v60 = vld [vmem:[#allocation9 + $0x20] ss:$16 sps:$4 sm:$0xff]   ;;  %vm2519_vm8 = vcmask 654912  }
  0x56   :  { %2731 = vmatprep.subr.bf16.mxu0 %v2885_v2  ;;  %616 = vadd.xlane.f32.xlu0 %v599_v15  ;;  %v613_v49 = vmul.f32 %v2606_v9, %v590_v46  ;;  %v2913_v61 = vld [vmem:[#allocation9 + $0x44] ss:$16 sps:$4 sm:$0xff]   ;;  %v2915_v62 = vld [vmem:[#allocation9 + $0x40] ss:$16 sps:$4 sm:$0xff]   ;;  %v3507_v9 = vmov 0   ;;  %vm2526_vm9 = vcmask 720512  }
  0x57   :  { %620 = vadd.xlane.f32.xlu1 %v601_v19  ;;  %999 = vmatpush1.bf16.msra.mxu1 %v2909_v58  ;;  %v2916_v63 = vld [vmem:[#allocation9 + $0x64] ss:$16 sps:$4 sm:$0xff]   ;;  %v2918_v0 = vld [vmem:[#allocation9 + $0x60] ss:$16 sps:$4 sm:$0xff]   ;;  %vm2533_vm10 = vcmask 786112   ;;  %vm2540_vm11 = vcmask 851712  }
  0x58   :  { %1000 = vmatprep.subr.bf16.mxu1 %v2910_v59  ;;  %v2919_v1 = vld [vmem:[#allocation9 + $0x84] ss:$16 sps:$4 sm:$0xff]   ;;  %1030 = vmatprep.mubr.bf16.mxu1 %v3507_v9  ;;  %vm2547_vm12 = vcmask 917312   ;;  %vm2554_vm13 = vcmask 982912   ;;  %vm2561_vm14 = vcmask 1048512  }
  0x59   :  { %v2922_v3 = vld [vmem:[#allocation9 + $0xa4] ss:$16 sps:$4 sm:$0xff]  }
  0x5a   :  { %622 = vadd.xlane.f32.xlu0 %v602_v21  ;;  %v2928_v7 = vld [vmem:[#allocation9 + $0xe4] ss:$16 sps:$4 sm:$0xff]   ;;  %v647_v21 = vstv %s4258_s3 }
  0x5b   :  { %624 = vadd.xlane.f32.xlu1 %v603_v24  ;;  %1001 = vmatpush1.bf16.msra.mxu1 %v2912_v60 }
  0x5c   :  { %1002 = vmatprep.subr.bf16.mxu1 %v2913_v61 }
  0x5d   :  { %2732 = vmatpush3.bf16.xpose.msra.mxu0 %v2885_v2  ;;  %v2921_v2 = vld [vmem:[#allocation9 + $0x80] ss:$16 sps:$4 sm:$0xff]  }
  0x5e   :  { %2733 = vmatprep.subr.bf16.mxu0 %v2886_v4  ;;  %626 = vadd.xlane.f32.xlu0 %v604_v26 }
  0x5f   :  { %628 = vadd.xlane.f32.xlu1 %v605_v30  ;;  %1003 = vmatpush1.bf16.msra.mxu1 %v2915_v62 }
  0x60   :  { %1004 = vmatprep.subr.bf16.mxu1 %v2916_v63 }
  0x62   :  { %630 = vadd.xlane.f32.xlu0 %v606_v32 }
  0x63   :  { %632 = vadd.xlane.f32.xlu1 %v607_v35  ;;  %1005 = vmatpush1.bf16.msra.mxu1 %v2918_v0 }
  0x64   :  { %1006 = vmatprep.subr.bf16.mxu1 %v2919_v1 }
  0x65   :  { %2734 = vmatpush3.bf16.xpose.msra.mxu0 %v2886_v4  ;;  %v2924_v4 = vld [vmem:[#allocation9 + $0xa0] ss:$16 sps:$4 sm:$0xff]  }
  0x66   :  { %2735 = vmatprep.subr.bf16.mxu0 %v2887_v17  ;;  %634 = vadd.xlane.f32.xlu0 %v608_v37 }
  0x67   :  { %636 = vadd.xlane.f32.xlu1 %v609_v41  ;;  %1007 = vmatpush1.bf16.msra.mxu1 %v2921_v2 }
  0x68   :  { %1008 = vmatprep.subr.bf16.mxu1 %v2922_v3 }
  0x6a   :  { %638 = vadd.xlane.f32.xlu0 %v610_v43 }
  0x6b   :  { %640 = vadd.xlane.f32.xlu1 %v611_v45  ;;  %1009 = vmatpush1.bf16.msra.mxu1 %v2924_v4 }
  0x6d   :  { %2736 = vmatpush3.bf16.xpose.msra.mxu0 %v2887_v17 }
  0x6e   :  { %2737 = vmatprep.subr.bf16.mxu0 %v2888_v28  ;;  %642 = vadd.xlane.f32.xlu0 %v612_v47 }
  0x6f   :  { %644 = vadd.xlane.f32.xlu1 %v613_v49 }
  0x75   :  { %2738 = vmatpush3.bf16.xpose.msra.mxu0 %v2888_v28 }
  0x76   :  { %2739 = vmatprep.subr.bf16.mxu0 %v2889_v39 }
  0x7d   :  { %2740 = vmatpush3.bf16.xpose.msra.mxu0 %v2889_v39 }
  0x7e   :  { %2741 = vmatprep.subr.bf16.mxu0 %v2890_v48 }
  0x85   :  { %2742 = vmatpush3.bf16.xpose.msra.mxu0 %v2890_v48 }
  0x8c   :  { %2744 = vmatmul.mubr.bf16.vlgmr.msra.gmra.mrb[0].mxu0 %v2892_v50 }
  0x8d   :  { %2747 = vmatprep.mubr.bf16.mxu0 %v2893_v51 }
  0x94   :  { %2748 = vmatmul.mubr.bf16.gmra.mrb[4].mxu0 %v2894_v52 }
  0x95   :  { %2751 = vmatprep.mubr.bf16.mxu0 %v2895_v53 }
  0x9c   :  { %2752 = vmatmul.mubr.bf16.gmra.mrb[8].mxu0 %v2896_v54 }
  0x9d   :  { %2755 = vmatprep.mubr.bf16.mxu0 %v2897_v55 }
  0xa4   :  { %2756 = vmatmul.mubr.bf16.gmra.mrb[12].mxu0 %v2898_v56 }
  0xa5   :  { %2759 = vmatprep.mubr.bf16.mxu0 %v3619_v5  ;;  %v2925_v5 = vld [vmem:[#allocation9 + $0xc4] ss:$16 sps:$4 sm:$0xff]  }
  0xa6   :  { %1010 = vmatprep.subr.bf16.mxu1 %v2925_v5 }
  0xac   :  { %2760 = vmatmul.mubr.bf16.gmra.mrb[16].mxu0 %v3621_v6  ;;  %v2927_v6 = vld [vmem:[#allocation9 + $0xc0] ss:$16 sps:$4 sm:$0xff]  }
  0xad   :  { %2763 = vmatprep.mubr.bf16.mxu0 %v3624_v8  ;;  %1011 = vmatpush1.bf16.msra.mxu1 %v2927_v6  ;;  %v2930_v8 = vld [vmem:[#allocation9 + $0xe0] ss:$16 sps:$4 sm:$0xff]  }
  0xae   :  { %1012 = vmatprep.subr.bf16.mxu1 %v2928_v7 }
  0xb1   :  { %1013 = vmatpush1.bf16.msra.mxu1 %v2930_v8 }
  0xb2   :  { %1111 = vmatprep.subr.bf16.mxu1 %v2933_v10 }
  0xb4   :  { %2764 = vmatmul.mubr.bf16.gmra.mrb[20].mxu0 %v3633_v18 }
  0xb5   :  { %2767 = vmatprep.mubr.bf16.mxu0 %v3637_v23 }
  0xbc   :  { %2768 = vmatmul.mubr.bf16.gmra.mrb[24].mxu0 %v120_v29 }
  0xbd   :  { %2771 = vmatprep.mubr.bf16.mxu0 %v122_v34 }
  0xc4   :  { %2772 = vmatmul.mubr.bf16.gmra.mrb[28].mxu0 %v124_v40 }
  0xdf   :  { %v615_v11 = vpop.xlane.xlu0 %614  ;;  %v619_v12 = vpop.xlane.xlu1 %618 }
  0xe0   :  { %v648_v23 = vadd.f32 %v647_v21, %v615_v11  ;;  %v650_v25 = vadd.f32 %v647_v21, %v619_v12 }
  0xe2   :  { %v664_v32 = vmul.f32 0.5, %v648_v23  ;;  %v666_v34 = vmul.f32 0.5, %v650_v25 }
  0xe3   :  { %v617_v13 = vpop.xlane.xlu0 %616 }
  0xe4   :  { %v621_v14 = vpop.xlane.xlu1 %620  ;;  %v649_v30 = vadd.f32 %v647_v21, %v617_v13  ;;  %3059 = vtanh.f32 %v664_v32 }
  0xe5   :  { %v651_v28 = vadd.f32 %v647_v21, %v621_v14  ;;  %3061 = vtanh.f32 %v666_v34 }
  0xe6   :  { %v665_v38 = vmul.f32 0.5, %v649_v30 }
  0xe7   :  { %v623_v15 = vpop.xlane.xlu0 %622  ;;  %v667_v36 = vmul.f32 0.5, %v651_v28 }
  0xe8   :  { %v625_v16 = vpop.xlane.xlu1 %624  ;;  %v652_v37 = vadd.f32 %v647_v21, %v623_v15 }
  0xe9   :  { %v653_v41 = vadd.f32 %v647_v21, %v625_v16  ;;  %3063 = vtanh.f32 %v667_v36 }
  0xea   :  { %v668_v46 = vmul.f32 0.5, %v652_v37  ;;  %3065 = vtanh.f32 %v665_v38 }
  0xeb   :  { %v627_v17 = vpop.xlane.xlu0 %626  ;;  %v669_v53 = vmul.f32 0.5, %v653_v41 }
  0xec   :  { %v629_v18 = vpop.xlane.xlu1 %628  ;;  %v654_v33 = vadd.f32 %v647_v21, %v627_v17 }
  0xed   :  { %v655_v39 = vadd.f32 %v647_v21, %v629_v18 }
  0xee   :  { %v670_v42 = vmul.f32 0.5, %v654_v33  ;;  %v3060_v1 = vpop.eup %3059 }
  0xef   :  { %v631_v19 = vpop.xlane.xlu0 %630  ;;  %v671_v49 = vmul.f32 0.5, %v655_v39  ;;  %v3062_v4 = vpop.eup %3061  ;;  %v696_v16 = vmul.f32 0.5, %v3060_v1 }
  0xf0   :  { %v633_v20 = vpop.xlane.xlu1 %632  ;;  %v656_v47 = vadd.f32 %v647_v21, %v631_v19  ;;  %3067 = vtanh.f32 %v670_v42  ;;  %v698_v19 = vmul.f32 0.5, %v3062_v4 }
  0xf1   :  { %v657_v54 = vadd.f32 %v647_v21, %v633_v20  ;;  %3069 = vtanh.f32 %v668_v46  ;;  %v712_v32 = vadd.f32 0.5, %v696_v16 }
  0xf2   :  { %v672_v57 = vmul.f32 0.5, %v656_v47  ;;  %3071 = vtanh.f32 %v671_v49  ;;  %v714_v36 = vadd.f32 0.5, %v698_v19 }
  0xf3   :  { %v635_v22 = vpop.xlane.xlu0 %634  ;;  %3073 = vtanh.f32 %v669_v53  ;;  %v673_v63 = vmul.f32 0.5, %v657_v54  ;;  %v3064_v7 = vpop.eup %3063 }
  0xf4   :  { %v637_v26 = vpop.xlane.xlu1 %636  ;;  %v658_v44 = vadd.f32 %v647_v21, %v635_v22  ;;  %v3066_v11 = vpop.eup %3065  ;;  %v699_v20 = vmul.f32 0.5, %v3064_v7 }
  0xf5   :  { %v659_v50 = vadd.f32 %v647_v21, %v637_v26  ;;  %v697_v25 = vmul.f32 0.5, %v3066_v11 }
  0xf6   :  { %v674_v55 = vmul.f32 0.5, %v658_v44  ;;  %v715_v37 = vadd.f32 0.5, %v699_v20 }
  0xf7   :  { %v639_v35 = vpop.xlane.xlu0 %638  ;;  %v675_v59 = vmul.f32 0.5, %v659_v50  ;;  %v713_v39 = vadd.f32 0.5, %v697_v25  ;;  %v3690_v50 = vmul.f32 10.0, %v714_v36 }
  0xf8   :  { %v641_v40 = vpop.xlane.xlu1 %640  ;;  %v660_v60 = vadd.f32 %v647_v21, %v639_v35  ;;  %3075 = vtanh.f32 %v674_v55  ;;  %v3694_v55 = vmul.f32 10.0, %v715_v37 }
  0xf9   :  { %v661_v0 = vadd.f32 %v647_v21, %v641_v40  ;;  %3077 = vtanh.f32 %v672_v57  ;;  %v3692_v54 = vmul.f32 10.0, %v713_v39 }
  0xfa   :  { %3079 = vtanh.f32 %v675_v59  ;;  %v676_v6 = vmul.f32 0.5, %v660_v60  ;;  %v3068_v13 = vpop.eup %3067 }
  0xfb   :  { %v643_v51 = vpop.xlane.xlu0 %642  ;;  %3081 = vtanh.f32 %v673_v63  ;;  %v677_v12 = vmul.f32 0.5, %v661_v0  ;;  %v3070_v17 = vpop.eup %3069  ;;  %v702_v26 = vmul.f32 0.5, %v3068_v13 }
  0xfc   :  { %v645_v56 = vpop.xlane.xlu1 %644  ;;  %v662_v58 = vadd.f32 %v647_v21, %v643_v51  ;;  %v700_v40 = vmul.f32 0.5, %v3070_v17 }
  0xfd   :  { %v663_v61 = vadd.f32 %v647_v21, %v645_v56  ;;  %v3072_v21 = vpop.eup %3071  ;;  %v718_v41 = vadd.f32 0.5, %v702_v26 }
  0xfe   :  { %v678_v3 = vmul.f32 0.5, %v662_v58  ;;  %v716_v57 = vadd.f32 0.5, %v700_v40 }
  0xff   :  { %v679_v10 = vmul.f32 0.5, %v663_v61  ;;  %v3696_v58 = vmul.f32 10.0, %v718_v41 }
 0x100   :  { %3083 = vtanh.f32 %v678_v3 }
 0x101   :  { %3085 = vtanh.f32 %v676_v6 }
 0x102   :  { %3087 = vtanh.f32 %v679_v10 }
 0x103   :  { %3089 = vtanh.f32 %v677_v12 }
 0x15f   :  { %v3651_v24 = vpop.f32.mrb[0].mxu0 }
 0x160   :  { %v3653_v27 = vpop.f32.mrb[1].mxu0  ;;  %v449_v14 = vmul.f32 0.5, %v3651_v24  ;;  %v3074_v24 = vpop.eup %3073 }
 0x161   :  { %v3655_v29 = vpop.f32.mrb[2].mxu0  ;;  %v447_v15 = vmul.f32 0.5, %v3653_v27  ;;  %v3076_v30 = vpop.eup %3075  ;;  %v701_v42 = vmul.f32 0.5, %v3074_v24 }
 0x162   :  { %v3657_v31 = vpop.f32.mrb[3].mxu0  ;;  %v450_v18 = vmul.f32 0.5, %v3655_v29  ;;  %3091 = vtanh.f32 %v449_v14  ;;  %v3078_v34 = vpop.eup %3077  ;;  %v706_v44 = vmul.f32 0.5, %v3076_v30 }
 0x163   :  { %v448_v22 = vmul.f32 0.5, %v3657_v31  ;;  %3093 = vtanh.f32 %v447_v15  ;;  %v3080_v38 = vpop.eup %3079  ;;  %v704_v47 = vmul.f32 0.5, %v3078_v34  ;;  %v717_v61 = vadd.f32 0.5, %v701_v42 }
 0x164   :  { %3095 = vtanh.f32 %v450_v18  ;;  %v707_v51 = vmul.f32 0.5, %v3080_v38  ;;  %v722_v0 = vadd.f32 0.5, %v706_v44 }
 0x165   :  { %3097 = vtanh.f32 %v448_v22  ;;  %v720_v6 = vadd.f32 0.5, %v704_v47  ;;  %v3705_v24 = vmul.f32 10.0, %v717_v61 }
 0x166   :  { %v723_v13 = vadd.f32 0.5, %v707_v51 }
 0x167   :  { %v2749_v43 = vpop.f32.mrb[4].mxu0  ;;  %v3709_v30 = vmul.f32 10.0, %v720_v6 }
 0x168   :  { %v3659_v45 = vpop.f32.mrb[5].mxu0  ;;  %v453_v28 = vmul.f32 0.5, %v2749_v43  ;;  %v703_v43 = vmul.f32 0.5, %v3072_v21  ;;  %v3700_v21 = vmul.f32 10.0, %v716_v57 }
 0x169   :  { %v3661_v48 = vpop.f32.mrb[6].mxu0  ;;  %v451_v29 = vmul.f32 0.5, %v3659_v45  ;;  %v3082_v45 = vpop.eup %3081 }
 0x16a   :  { %v3663_v52 = vpop.f32.mrb[7].mxu0  ;;  %v454_v31 = vmul.f32 0.5, %v3661_v48  ;;  %3099 = vtanh.f32 %v453_v28  ;;  %v3084_v49 = vpop.eup %3083  ;;  %v3688_v48 = vmul.f32 10.0, %v712_v32  ;;  %v719_v63 = vadd.f32 0.5, %v703_v43 }
 0x16b   :  { %3101 = vtanh.f32 %v451_v29  ;;  %v452_v46 = vmul.f32 0.5, %v3663_v52  ;;  %v3086_v53 = vpop.eup %3085  ;;  %v705_v7 = vmul.f32 0.5, %v3082_v45  ;;  %v710_v14 = vmul.f32 0.5, %v3084_v49 }
 0x16c   :  { %3103 = vtanh.f32 %v454_v31  ;;  %v3088_v59 = vpop.eup %3087  ;;  %v708_v18 = vmul.f32 0.5, %v3086_v53  ;;  %v3702_v22 = vmul.f32 10.0, %v719_v63  ;;  %v3707_v28 = vmul.f32 10.0, %v722_v0 }
 0x16d   :  { %v3090_v1 = vpop.eup %3089  ;;  %3105 = vtanh.f32 %v452_v46  ;;  %v3711_v29 = vadd.f32 0.5, %v705_v7  ;;  %v3713_v32 = vmul.f32 10.0, %v723_v13 }
 0x16e   :  { %v3092_v10 = vpop.eup %3091  ;;  %v3717_v37 = vadd.f32 0.5, %v708_v18 }
 0x16f   :  { %v3665_v62 = vpop.f32.mrb[8].mxu0  ;;  %v3094_v15 = vpop.eup %3093  ;;  %v513_v31 = vmul.f32 0.5, %v3092_v10 }
 0x170   :  { %v3667_v2 = vpop.f32.mrb[9].mxu0  ;;  %v457_v16 = vmul.f32 0.5, %v3665_v62  ;;  %v3096_v19 = vpop.eup %3095  ;;  %v511_v39 = vmul.f32 0.5, %v3094_v15 }
 0x171   :  { %v3669_v5 = vpop.f32.mrb[10].mxu0  ;;  %v455_v20 = vmul.f32 0.5, %v3667_v2  ;;  %v3098_v25 = vpop.eup %3097  ;;  %v3715_v2 = vadd.f32 0.5, %v710_v14  ;;  %v514_v40 = vmul.f32 0.5, %v3096_v19  ;;  %v545_v61 = vadd.f32 0.5, %v513_v31 }
 0x172   :  { %v3671_v8 = vpop.f32.mrb[11].mxu0  ;;  %v458_v26 = vmul.f32 0.5, %v3669_v5  ;;  %v3719_v5 = vmul.f32 0.5, %v3088_v59  ;;  %v512_v43 = vmul.f32 0.5, %v3098_v25  ;;  %v543_v63 = vadd.f32 0.5, %v511_v39 }
 0x173   :  { %v456_v44 = vmul.f32 0.5, %v3671_v8  ;;  %v546_v0 = vadd.f32 0.5, %v514_v40 }
 0x174   :  { %v3100_v62 = vpop.eup %3099  ;;  %v544_v8 = vadd.f32 0.5, %v512_v43  ;;  %v2955_v43 = vld [vmem:[#allocation10] ss:$8 sps:$4 sm:$0xff]  }
 0x175   :  { %v3102_v34 = vpop.eup %3101  ;;  %v517_v47 = vmul.f32 0.5, %v3100_v62 }
 0x176   :  { %v3104_v38 = vpop.eup %3103  ;;  %v515_v49 = vmul.f32 0.5, %v3102_v34 }
 0x177   :  { %v3677_v23 = vpop.f32.mrb[12].mxu0  ;;  %v518_v57 = vmul.f32 0.5, %v3104_v38  ;;  %v3725_v10 = vadd.f32 0.5, %v517_v47  ;;  %v2957_v47 = vld [vmem:[#allocation10 + $0x4] ss:$8 sps:$4 sm:$0xff]  }
 0x178   :  { %v3679_v27 = vpop.f32.mrb[13].mxu0  ;;  %1908 = vmatprep.subr.bf16.mxu0 %v2957_v47 }
 0x179   :  { %v3682_v33 = vpop.f32.mrb[14].mxu0  ;;  %v3729_v13 = vadd.f32 0.5, %v518_v57  ;;  %v459_v18 = vmul.f32 0.5, %v3679_v27  ;;  %v2960_v57 = vld [vmem:[#allocation10 + $0x14] ss:$8 sps:$4 sm:$0xff]   ;;  %1909 = vmatpush1.bf16.msra.mxu0 %v2955_v43 }
 0x17a   :  { %v3685_v35 = vpop.f32.mrb[15].mxu0  ;;  %1910 = vmatprep.subr.bf16.mxu0 %v2960_v57  ;;  %v2934_v43 = vld [vmem:[#allocation9 + $0x28] ss:$16 sps:$4 sm:$0xff]  }
 0x17f   :  { %v2761_v56 = vpop.f32.mrb[16].mxu0 }
 0x180   :  { %v465_v60 = vmul.f32 0.5, %v2761_v56  ;;  %v384_v52 = vpop.f32.mrb[17].mxu0  ;;  %v3106_v56 = vpop.eup %3105 }
 0x181   :  { %v463_v3 = vmul.f32 0.5, %v384_v52  ;;  %v2762_v4 = vpop.f32.mrb[18].mxu0  ;;  %v516_v14 = vmul.f32 0.5, %v3106_v56 }
 0x182   :  { %3107 = vtanh.f32 %v465_v60  ;;  %v466_v11 = vmul.f32 0.5, %v2762_v4  ;;  %v387_v12 = vpop.f32.mrb[19].mxu0  ;;  %v3722_v60 = vmul.f32 0.5, %v3090_v1  ;;  %v461_v4 = vmul.f32 0.5, %v3677_v23 }
 0x183   :  { %3109 = vtanh.f32 %v463_v3  ;;  %v464_v17 = vmul.f32 0.5, %v387_v12 }
 0x184   :  { %3111 = vtanh.f32 %v466_v11  ;;  %v3727_v11 = vadd.f32 0.5, %v515_v49 }
 0x185   :  { %3113 = vtanh.f32 %v464_v17 }
 0x186   :  { %3115 = vtanh.f32 %v457_v16 }
 0x187   :  { %v2765_v36 = vpop.f32.mrb[20].mxu0  ;;  %3117 = vtanh.f32 %v455_v20 }
 0x188   :  { %v469_v41 = vmul.f32 0.5, %v2765_v36  ;;  %v400_v42 = vpop.f32.mrb[21].mxu0  ;;  %3119 = vtanh.f32 %v458_v26 }
 0x189   :  { %v467_v45 = vmul.f32 0.5, %v400_v42  ;;  %v2766_v46 = vpop.f32.mrb[22].mxu0 }
 0x18a   :  { %3121 = vtanh.f32 %v469_v41  ;;  %v470_v51 = vmul.f32 0.5, %v2766_v46  ;;  %v403_v53 = vpop.f32.mrb[23].mxu0 }
 0x18b   :  { %3123 = vtanh.f32 %v467_v45  ;;  %v468_v59 = vmul.f32 0.5, %v403_v53  ;;  %v460_v53 = vmul.f32 0.5, %v3685_v35  ;;  %v2958_v35 = vld [vmem:[#allocation10 + $0x10] ss:$8 sps:$4 sm:$0xff]  }
 0x18c   :  { %v3108_v52 = vpop.eup %3107  ;;  %3125 = vtanh.f32 %v470_v51  ;;  %v3739_v51 = vadd.f32 0.5, %v516_v14  ;;  %v2936_v14 = vld [vmem:[#allocation9 + $0x2c] ss:$16 sps:$4 sm:$0xff]   ;;  %1911 = vmatpush1.bf16.msra.mxu0 %v2958_v35 }
 0x18d   :  { %v3110_v3 = vpop.eup %3109  ;;  %v529_v6 = vmul.f32 0.5, %v3108_v52  ;;  %3127 = vtanh.f32 %v468_v59 }
 0x18e   :  { %v3112_v7 = vpop.eup %3111  ;;  %3129 = vtanh.f32 %v456_v44  ;;  %v527_v12 = vmul.f32 0.5, %v3110_v3  ;;  %v462_v44 = vmul.f32 0.5, %v3682_v33  ;;  %v2931_v3 = vld [vmem:[#allocation9 + $0x8] ss:$16 sps:$4 sm:$0xff]  }
 0x18f   :  { %v3114_v1 = vpop.eup %3113  ;;  %v561_v15 = vadd.f32 0.5, %v529_v6  ;;  %v530_v16 = vmul.f32 0.5, %v3112_v7  ;;  %v2769_v17 = vpop.f32.mrb[24].mxu0  ;;  %3131 = vtanh.f32 %v461_v4 }
 0x190   :  { %v559_v19 = vadd.f32 0.5, %v527_v12  ;;  %v528_v23 = vmul.f32 0.5, %v3114_v1  ;;  %v473_v20 = vmul.f32 0.5, %v2769_v17  ;;  %v416_v25 = vpop.f32.mrb[25].mxu0  ;;  %v3732_v26 = vpop.eup %3115 }
 0x191   :  { %v746_v62 = vsub.f32 %v545_v61, %v561_v15  ;;  %v562_v34 = vadd.f32 0.5, %v530_v16  ;;  %v471_v31 = vmul.f32 0.5, %v416_v25  ;;  %v2770_v36 = vpop.f32.mrb[26].mxu0  ;;  %v3734_v38 = vpop.eup %3117 }
 0x192   :  { %v744_v39 = vsub.f32 %v543_v63, %v559_v19  ;;  %v560_v40 = vadd.f32 0.5, %v528_v23  ;;  %3133 = vtanh.f32 %v473_v20  ;;  %v474_v41 = vmul.f32 0.5, %v2770_v36  ;;  %v419_v42 = vpop.f32.mrb[27].mxu0  ;;  %v3736_v27 = vpop.eup %3119 }
 0x193   :  { %v747_v45 = vsub.f32 %v546_v0, %v562_v34  ;;  %3135 = vtanh.f32 %v471_v31  ;;  %v472_v46 = vmul.f32 0.5, %v419_v42  ;;  %v762_v61 = vmul.f32 %v746_v62, %v3690_v50 }
 0x194   :  { %v3122_v49 = vpop.eup %3121  ;;  %v745_v56 = vsub.f32 %v544_v8, %v560_v40  ;;  %3137 = vtanh.f32 %v474_v41  ;;  %v760_v4 = vmul.f32 %v744_v39, %v3688_v48  ;;  %v2963_v48 = vld [vmem:[#allocation10 + $0x24] ss:$8 sps:$4 sm:$0xff]   ;;  %v2961_v39 = vld [vmem:[#allocation10 + $0x20] ss:$8 sps:$4 sm:$0xff]   ;;  %v521_v41 = vmul.f32 0.5, %v3732_v26 }
 0x195   :  { %v3124_v59 = vpop.eup %3123  ;;  %v533_v52 = vmul.f32 0.5, %v3122_v49  ;;  %3139 = vtanh.f32 %v472_v46  ;;  %v763_v63 = vmul.f32 %v747_v45, %v3694_v55  ;;  %v519_v45 = vmul.f32 0.5, %v3734_v38  ;;  %v2939_v49 = vld [vmem:[#allocation9 + $0x4c] ss:$16 sps:$4 sm:$0xff]   ;;  %1912 = vmatprep.subr.bf16.mxu0 %v2963_v48  ;;  %v2967_v48 = vld [vmem:[#allocation10 + $0x40] ss:$8 sps:$4 sm:$0xff]  }
 0x196   :  { %v3126_v33 = vpop.eup %3125  ;;  %3141 = vtanh.f32 %v459_v18  ;;  %v531_v0 = vmul.f32 0.5, %v3124_v59  ;;  %v761_v6 = vmul.f32 %v745_v56, %v3692_v54  ;;  %v522_v46 = vmul.f32 0.5, %v3736_v27  ;;  %1913 = vmatpush1.bf16.msra.mxu0 %v2961_v39 }
 0x197   :  { %v3128_v8 = vpop.eup %3127  ;;  %3143 = vtanh.f32 %v462_v44  ;;  %v565_v7 = vadd.f32 0.5, %v533_v52  ;;  %v534_v12 = vmul.f32 0.5, %v3126_v33  ;;  %v2773_v1 = vpop.f32.mrb[28].mxu0  ;;  %v3746_v50 = vpack.c.bf16 %v763_v63, %v762_v61  ;;  %v2937_v61 = vld [vmem:[#allocation9 + $0x48] ss:$16 sps:$4 sm:$0xff]  }
 0x198   :  { %v3130_v55 = vpop.eup %3129  ;;  %v563_v15 = vadd.f32 0.5, %v531_v0  ;;  %v532_v16 = vmul.f32 0.5, %v3128_v8  ;;  %v477_v17 = vmul.f32 0.5, %v2773_v1  ;;  %v432_v18 = vpop.f32.mrb[29].mxu0  ;;  %v3748_v19 = vpack.c.bf16 %v761_v6, %v760_v4  ;;  %v2942_v4 = vld [vmem:[#allocation9 + $0x6c] ss:$16 sps:$4 sm:$0xff]  }
 0x199   :  { %3145 = vtanh.f32 %v460_v53  ;;  %v750_v54 = vsub.f32 %v3725_v10, %v565_v7  ;;  %v566_v23 = vadd.f32 0.5, %v534_v12  ;;  %v475_v20 = vmul.f32 0.5, %v432_v18  ;;  %v2774_v25 = vpop.f32.mrb[30].mxu0  ;;  %v3132_v40 = vpop.eup %3131 }
 0x19a   :  { %v748_v62 = vsub.f32 %v3727_v11, %v563_v15  ;;  %v564_v34 = vadd.f32 0.5, %v532_v16  ;;  %3147 = vtanh.f32 %v477_v17  ;;  %v478_v31 = vmul.f32 0.5, %v2774_v25  ;;  %v435_v36 = vpop.f32.mrb[31].mxu0  ;;  %1031 = vmatmul.mubr.bf16.vlgmr.msra.gmra.mrb[0].mxu1 %v3748_v19  ;;  %v2966_v11 = vld [vmem:[#allocation10 + $0x34] ss:$8 sps:$4 sm:$0xff]  }
 0x19b   :  { %v751_v42 = vsub.f32 %v3729_v13, %v566_v23  ;;  %3149 = vtanh.f32 %v475_v20  ;;  %v476_v10 = vmul.f32 0.5, %v435_v36  ;;  %1112 = vmatpush1.bf16.msra.mxu1 %v2931_v3  ;;  %1040 = vmatprep.mubr.bf16.mxu1 %v3507_v9  ;;  %v766_v53 = vmul.f32 %v750_v54, %v3696_v58 }
 0x19c   :  { %v3134_v44 = vpop.eup %3133  ;;  %v749_v47 = vsub.f32 %v3739_v51, %v564_v34  ;;  %3151 = vtanh.f32 %v478_v31  ;;  %1113 = vmatprep.subr.bf16.mxu1 %v2936_v14  ;;  %v520_v59 = vmul.f32 0.5, %v3130_v55  ;;  %v764_v38 = vmul.f32 %v748_v62, %v3700_v21  ;;  %v2964_v51 = vld [vmem:[#allocation10 + $0x30] ss:$8 sps:$4 sm:$0xff]   ;;  %1914 = vmatprep.subr.bf16.mxu0 %v2966_v11  ;;  %v2969_v21 = vld [vmem:[#allocation10 + $0x44] ss:$8 sps:$4 sm:$0xff]  }
 0x19d   :  { %v3136_v26 = vpop.eup %3135  ;;  %v537_v13 = vmul.f32 0.5, %v3134_v44  ;;  %3153 = vtanh.f32 %v476_v10  ;;  %v767_v56 = vmul.f32 %v751_v42, %v3702_v22  ;;  %v553_v33 = vadd.f32 0.5, %v521_v41  ;;  %1915 = vmatpush1.bf16.msra.mxu0 %v2964_v51  ;;  %v2972_v62 = vld [vmem:[#allocation10 + $0x54] ss:$8 sps:$4 sm:$0xff]  }
 0x19e   :  { %v3138_v57 = vpop.eup %3137  ;;  %v535_v52 = vmul.f32 0.5, %v3136_v26  ;;  %v765_v27 = vmul.f32 %v749_v47, %v3705_v24  ;;  %v551_v22 = vadd.f32 0.5, %v519_v45  ;;  %v554_v12 = vadd.f32 0.5, %v522_v46  ;;  %v2945_v41 = vld [vmem:[#allocation9 + $0x8c] ss:$16 sps:$4 sm:$0xff]   ;;  %1916 = vmatprep.subr.bf16.mxu0 %v2969_v21 }
 0x19f   :  { %v3140_v63 = vpop.eup %3139  ;;  %v569_v0 = vadd.f32 0.5, %v537_v13  ;;  %v538_v3 = vmul.f32 0.5, %v3138_v57  ;;  %1114 = vmatpush1.bf16.msra.mxu1 %v2934_v43  ;;  %v3763_v6 = vpack.c.bf16 %v767_v56, %v766_v53  ;;  %v737_v1 = vmul.f32 10.0, %v3711_v29  ;;  %v2940_v29 = vld [vmem:[#allocation9 + $0x68] ss:$16 sps:$4 sm:$0xff]  }
 0x1a0   :  { %v3142_v58 = vpop.eup %3141  ;;  %v567_v35 = vadd.f32 0.5, %v535_v52  ;;  %v536_v8 = vmul.f32 0.5, %v3140_v63  ;;  %1115 = vmatprep.subr.bf16.mxu1 %v2939_v49  ;;  %v3765_v7 = vpack.c.bf16 %v765_v27, %v764_v38  ;;  %v552_v15 = vadd.f32 0.5, %v520_v59  ;;  %v2943_v46 = vld [vmem:[#allocation9 + $0x88] ss:$16 sps:$4 sm:$0xff]  }
 0x1a1   :  { %v3144_v24 = vpop.eup %3143  ;;  %v754_v14 = vsub.f32 %v553_v33, %v569_v0  ;;  %v570_v55 = vadd.f32 0.5, %v538_v3  ;;  %v3769_v18 = vmul.f32 10.0, %v3715_v2  ;;  %v525_v23 = vmul.f32 0.5, %v3132_v40  ;;  %1917 = vmatpush1.bf16.msra.mxu0 %v2967_v48  ;;  %v2970_v49 = vld [vmem:[#allocation10 + $0x50] ss:$8 sps:$4 sm:$0xff]  }
 0x1a2   :  { %v752_v16 = vsub.f32 %v551_v22, %v567_v35  ;;  %v568_v17 = vadd.f32 0.5, %v536_v8  ;;  %1041 = vmatmul.mubr.bf16.gmra.mrb[4].mxu1 %v3746_v50  ;;  %v727_v25 = vadd.f32 0.5, %v3719_v5  ;;  %v523_v31 = vmul.f32 0.5, %v3142_v58  ;;  %v2948_v56 = vld [vmem:[#allocation9 + $0xac] ss:$16 sps:$4 sm:$0xff]   ;;  %1918 = vmatprep.subr.bf16.mxu0 %v2972_v62 }
 0x1a3   :  { %v3146_v54 = vpop.eup %3145  ;;  %v755_v20 = vsub.f32 %v554_v12, %v570_v55  ;;  %1050 = vmatprep.mubr.bf16.mxu1 %v3507_v9  ;;  %1116 = vmatpush1.bf16.msra.mxu1 %v2937_v61  ;;  %v740_v36 = vmul.f32 10.0, %v3717_v37  ;;  %v725_v39 = vadd.f32 0.5, %v3722_v60  ;;  %v526_v40 = vmul.f32 0.5, %v3144_v24  ;;  %v2975_v61 = vld [vmem:[#allocation10 + $0x64] ss:$8 sps:$4 sm:$0xff]  }
 0x1a4   :  { %v3148_v34 = vpop.eup %3147  ;;  %v753_v2 = vsub.f32 %v552_v15, %v568_v17  ;;  %1117 = vmatprep.subr.bf16.mxu1 %v2942_v4  ;;  %v770_v5 = vmul.f32 %v754_v14, %v3707_v28  ;;  %v524_v44 = vmul.f32 0.5, %v3146_v54  ;;  %v768_v47 = vmul.f32 %v752_v16, %v3709_v30  ;;  %v2973_v4 = vld [vmem:[#allocation10 + $0x60] ss:$8 sps:$4 sm:$0xff]   ;;  %v2978_v35 = vld [vmem:[#allocation10 + $0x74] ss:$8 sps:$4 sm:$0xff]  }
 0x1a5   :  { %v3150_v42 = vpop.eup %3149  ;;  %v541_v10 = vmul.f32 0.5, %v3148_v34  ;;  %v771_v43 = vmul.f32 %v755_v20, %v3713_v32  ;;  %v557_v26 = vadd.f32 0.5, %v525_v23  ;;  %v555_v28 = vadd.f32 0.5, %v523_v31  ;;  %1919 = vmatpush1.bf16.msra.mxu0 %v2970_v49  ;;  %v2946_v22 = vld [vmem:[#allocation9 + $0xa8] ss:$16 sps:$4 sm:$0xff]  }
 0x1a6   :  { %v3152_v11 = vpop.eup %3151  ;;  %v539_v45 = vmul.f32 0.5, %v3150_v42  ;;  %v769_v37 = vmul.f32 %v753_v2, %v737_v1  ;;  %v558_v30 = vadd.f32 0.5, %v526_v40  ;;  %v743_v38 = vmul.f32 10.0, %v727_v25  ;;  %v2951_v21 = vld [vmem:[#allocation9 + $0xcc] ss:$16 sps:$4 sm:$0xff]   ;;  %1920 = vmatprep.subr.bf16.mxu0 %v2975_v61 }
 0x1a7   :  { %v3154_v60 = vpop.eup %3153  ;;  %v573_v13 = vadd.f32 0.5, %v541_v10  ;;  %v542_v53 = vmul.f32 0.5, %v3152_v11  ;;  %1118 = vmatpush1.bf16.msra.mxu1 %v2940_v29  ;;  %v3779_v57 = vpack.c.bf16 %v771_v43, %v770_v5  ;;  %v556_v63 = vadd.f32 0.5, %v524_v44  ;;  %v2976_v55 = vld [vmem:[#allocation10 + $0x70] ss:$8 sps:$4 sm:$0xff]  }
 0x1a8   :  { %v571_v32 = vadd.f32 0.5, %v539_v45  ;;  %v540_v59 = vmul.f32 0.5, %v3154_v60  ;;  %1119 = vmatprep.subr.bf16.mxu1 %v2945_v41  ;;  %v3781_v52 = vpack.c.bf16 %v769_v37, %v768_v47  ;;  %v741_v33 = vmul.f32 10.0, %v725_v39  ;;  %v2949_v15 = vld [vmem:[#allocation9 + $0xc8] ss:$16 sps:$4 sm:$0xff]  }
 0x1a9   :  { %v758_v27 = vsub.f32 %v557_v26, %v573_v13  ;;  %v574_v51 = vadd.f32 0.5, %v542_v53  ;;  %1921 = vmatpush1.bf16.msra.mxu0 %v2973_v4  ;;  %v2954_v48 = vld [vmem:[#allocation9 + $0xec] ss:$16 sps:$4 sm:$0xff]   ;;  %v2979_v23 = vld [vmem:[#allocation10 + $0x80] ss:$8 sps:$4 sm:$0xff]   ;;  %v818_v4 = vlaneseq }
 0x1aa   :  { %v756_v0 = vsub.f32 %v555_v28, %v571_v32  ;;  %v572_v3 = vadd.f32 0.5, %v540_v59  ;;  %1051 = vmatmul.mubr.bf16.gmra.mrb[8].mxu1 %v3765_v7  ;;  %1922 = vmatprep.subr.bf16.mxu0 %v2978_v35  ;;  %v2981_v54 = vld [vmem:[#allocation10 + $0x84] ss:$8 sps:$4 sm:$0xff]   ;;  %v2984_v20 = vld [vmem:[#allocation10 + $0x94] ss:$8 sps:$4 sm:$0xff]  }
 0x1ab   :  { %v759_v58 = vsub.f32 %v558_v30, %v574_v51  ;;  %1060 = vmatprep.mubr.bf16.mxu1 %v3507_v9  ;;  %1120 = vmatpush1.bf16.msra.mxu1 %v2943_v46  ;;  %v774_v24 = vmul.f32 %v758_v27, %v3769_v18  ;;  %v2952_v18 = vld [vmem:[#allocation9 + $0xe8] ss:$16 sps:$4 sm:$0xff]   ;;  %v2987_v29 = vld [vmem:[#allocation10 + $0xa4] ss:$8 sps:$4 sm:$0xff]   ;;  %v2990_v34 = vld [vmem:[#allocation10 + $0xb4] ss:$8 sps:$4 sm:$0xff]  }
 0x1ac   :  { %v757_v8 = vsub.f32 %v556_v63, %v572_v3  ;;  %1121 = vmatprep.subr.bf16.mxu1 %v2948_v56  ;;  %v772_v1 = vmul.f32 %v756_v0, %v740_v36  ;;  %v2982_v25 = vld [vmem:[#allocation10 + $0x90] ss:$8 sps:$4 sm:$0xff]   ;;  %v2985_v62 = vld [vmem:[#allocation10 + $0xa0] ss:$8 sps:$4 sm:$0xff]   ;;  %v2996_v36 = vld [vmem:[#allocation10 + $0xd4] ss:$8 sps:$4 sm:$0xff]  }
 0x1ad   :  { %v775_v12 = vmul.f32 %v759_v58, %v743_v38  ;;  %1923 = vmatpush1.bf16.msra.mxu0 %v2976_v55  ;;  %v2988_v31 = vld [vmem:[#allocation10 + $0xb0] ss:$8 sps:$4 sm:$0xff]   ;;  %v2999_v2 = vld [vmem:[#allocation10 + $0xe4] ss:$8 sps:$4 sm:$0xff]   ;;  %v2997_v39 = vld [vmem:[#allocation10 + $0xe0] ss:$8 sps:$4 sm:$0xff]  }
 0x1ae   :  { %v773_v14 = vmul.f32 %v757_v8, %v741_v33  ;;  %1924 = vmatprep.subr.bf16.mxu0 %v2981_v54  ;;  %v3000_v41 = vld [vmem:[#allocation10 + $0xf0] ss:$8 sps:$4 sm:$0xff]   ;;  %v3005_v42 = vld [vmem:[#allocation10 + $0x104] ss:$8 sps:$4 sm:$0xff]   ;;  %v3812_v40 = vld [vmem:[#allocation10 + $0x100] ss:$8 sps:$4 sm:$0xff]  }
 0x1af   :  { %1122 = vmatpush1.bf16.msra.mxu1 %v2946_v22  ;;  %v3786_v16 = vpack.c.bf16 %v775_v12, %v774_v24  ;;  %v3815_v10 = vld [vmem:[#allocation10 + $0x114] ss:$8 sps:$4 sm:$0xff]   ;;  %v3818_v5 = vld [vmem:[#allocation10 + $0x110] ss:$8 sps:$4 sm:$0xff]   ;;  %v3823_v43 = vld [vmem:[#allocation10 + $0x124] ss:$8 sps:$4 sm:$0xff]  }
 0x1b0   :  { %1123 = vmatprep.subr.bf16.mxu1 %v2951_v21  ;;  %v3788_v17 = vpack.c.bf16 %v773_v14, %v772_v1  ;;  %v3825_v11 = vld [vmem:[#allocation10 + $0x120] ss:$8 sps:$4 sm:$0xff]   ;;  %v3829_v44 = vld [vmem:[#allocation10 + $0x134] ss:$8 sps:$4 sm:$0xff]   ;;  %v3832_v45 = vld [vmem:[#allocation10 + $0x130] ss:$8 sps:$4 sm:$0xff]  }
 0x1b1   :  { %1925 = vmatpush1.bf16.msra.mxu0 %v2979_v23  ;;  %v3838_v46 = vld [vmem:[#allocation10 + $0x140] ss:$8 sps:$4 sm:$0xff]   ;;  %v3842_v47 = vld [vmem:[#allocation10 + $0x154] ss:$8 sps:$4 sm:$0xff]   ;;  %v3844_v37 = vld [vmem:[#allocation10 + $0x150] ss:$8 sps:$4 sm:$0xff]  }
 0x1b2   :  { %1061 = vmatmul.mubr.bf16.gmra.mrb[12].mxu1 %v3763_v6  ;;  %1926 = vmatprep.subr.bf16.mxu0 %v2984_v20  ;;  %v3848_v49 = vld [vmem:[#allocation10 + $0x164] ss:$8 sps:$4 sm:$0xff]   ;;  %v3850_v60 = vld [vmem:[#allocation10 + $0x160] ss:$8 sps:$4 sm:$0xff]   ;;  %v3854_v26 = vld [vmem:[#allocation10 + $0x174] ss:$8 sps:$4 sm:$0xff]  }
 0x1b3   :  { %1070 = vmatprep.mubr.bf16.mxu1 %v3507_v9  ;;  %1124 = vmatpush1.bf16.msra.mxu1 %v2949_v15  ;;  %v3856_v13 = vld [vmem:[#allocation10 + $0x170] ss:$8 sps:$4 sm:$0xff]   ;;  %v3860_v53 = vld [vmem:[#allocation10 + $0x184] ss:$8 sps:$4 sm:$0xff]   ;;  %v3862_v56 = vld [vmem:[#allocation10 + $0x180] ss:$8 sps:$4 sm:$0xff]  }
 0x1b4   :  { %1125 = vmatprep.subr.bf16.mxu1 %v2954_v48  ;;  %v3868_v28 = vld [vmem:[#allocation10 + $0x190] ss:$8 sps:$4 sm:$0xff]   ;;  %v3872_v32 = vld [vmem:[#allocation10 + $0x1a4] ss:$8 sps:$4 sm:$0xff]   ;;  %v3874_v59 = vld [vmem:[#allocation10 + $0x1a0] ss:$8 sps:$4 sm:$0xff]  }
 0x1b5   :  { %1927 = vmatpush1.bf16.msra.mxu0 %v2982_v25  ;;  %v3880_v61 = vld [vmem:[#allocation10 + $0x1b0] ss:$8 sps:$4 sm:$0xff]   ;;  %v3884_v30 = vld [vmem:[#allocation10 + $0x1c4] ss:$8 sps:$4 sm:$0xff]   ;;  %v3886_v38 = vld [vmem:[#allocation10 + $0x1c0] ss:$8 sps:$4 sm:$0xff]  }
 0x1b6   :  { %1928 = vmatprep.subr.bf16.mxu0 %v2987_v29  ;;  %v3890_v27 = vld [vmem:[#allocation10 + $0x1d4] ss:$8 sps:$4 sm:$0xff]   ;;  %v3892_v51 = vld [vmem:[#allocation10 + $0x1d0] ss:$8 sps:$4 sm:$0xff]   ;;  %v3896_v63 = vld [vmem:[#allocation10 + $0x1e4] ss:$8 sps:$4 sm:$0xff]  }
 0x1b7   :  { %1126 = vmatpush1.bf16.msra.mxu1 %v2952_v18  ;;  %v3898_v33 = vld [vmem:[#allocation10 + $0x1e0] ss:$8 sps:$4 sm:$0xff]   ;;  %v3902_v0 = vld [vmem:[#allocation10 + $0x1f4] ss:$8 sps:$4 sm:$0xff]   ;;  %v3904_v3 = vld [vmem:[#allocation10 + $0x1f0] ss:$8 sps:$4 sm:$0xff]  }
 0x1b8   :  { %2775 = vmatprep.subr.bf16.mxu1 %v3005_v42  ;;  %v3909_v58 = vshrl.u32 %v818_v4, 7  ;;  %v3917_v35 = vld [vmem:[%s4260_s5] sm:$0xf] }
 0x1b9   :  { %1929 = vmatpush1.bf16.msra.mxu0 %v2985_v62 }
 0x1ba   :  { %1071 = vmatmul.mubr.bf16.gmra.mrb[16].mxu1 %v3781_v52  ;;  %1930 = vmatprep.subr.bf16.mxu0 %v2990_v34  ;;  %v3912_v22 = vsub.s32 0, %v3909_v58  ;;  %v3920_v8 = vsub.s32 1, %v3909_v58 }
 0x1bb   :  { %1080 = vmatprep.mubr.bf16.mxu1 %v3507_v9 }
 0x1bc   :  { %v3924_v21 = vrot.slane %v3917_v35, %v3912_v22  ;;  %v3928_v24 = vrot.slane %v3917_v35, %v3920_v8 }
 0x1bd   :  { %1931 = vmatpush1.bf16.msra.mxu0 %v2988_v31 }
 0x1c2   :  { %1081 = vmatmul.mubr.bf16.gmra.mrb[20].mxu1 %v3779_v57 }
 0x1c3   :  { %1090 = vmatprep.mubr.bf16.mxu1 %v3507_v9 }
 0x1ca   :  { %1091 = vmatmul.mubr.bf16.gmra.mrb[24].mxu1 %v3788_v17 }
 0x1cb   :  { %1100 = vmatprep.mubr.bf16.mxu1 %v3507_v9 }
 0x1d2   :  { %1101 = vmatmul.mubr.bf16.gmra.mrb[28].mxu1 %v3786_v16 }
 0x1d3   :  { %1143 = vmatprep.mubr.bf16.mxu1 %v3507_v9 }
 0x1da   :  { %1144 = vmatmul.mubr.bf16.vlgmr.msra.gmra.mrb[32].mxu1 %v3748_v19  ;;  %v2993_v19 = vld [vmem:[#allocation10 + $0xc4] ss:$8 sps:$4 sm:$0xff]  }
 0x1db   :  { %1153 = vmatprep.mubr.bf16.mxu1 %v3507_v9  ;;  %1932 = vmatprep.subr.bf16.mxu0 %v2993_v19 }
 0x1dc   :  { %2791 = vmatpush1.bf16.msra.mxu1 %v3812_v40 }
 0x1dd   :  { %2776 = vmatprep.subr.bf16.mxu1 %v3815_v10 }
 0x1e0   :  { %2792 = vmatpush1.bf16.msra.mxu1 %v3818_v5 }
 0x1e1   :  { %2777 = vmatprep.subr.bf16.mxu1 %v3823_v43 }
 0x1e2   :  { %1154 = vmatmul.mubr.bf16.gmra.mrb[36].mxu1 %v3746_v50  ;;  %v2991_v50 = vld [vmem:[#allocation10 + $0xc0] ss:$8 sps:$4 sm:$0xff]  }
 0x1e3   :  { %1163 = vmatprep.mubr.bf16.mxu1 %v3507_v9  ;;  %1933 = vmatpush1.bf16.msra.mxu0 %v2991_v50 }
 0x1e4   :  { %1934 = vmatprep.subr.bf16.mxu0 %v2996_v36  ;;  %2793 = vmatpush1.bf16.msra.mxu1 %v3825_v11 }
 0x1e5   :  { %2778 = vmatprep.subr.bf16.mxu1 %v3829_v44 }
 0x1e8   :  { %2794 = vmatpush1.bf16.msra.mxu1 %v3832_v45 }
 0x1ea   :  { %1164 = vmatmul.mubr.bf16.gmra.mrb[40].mxu1 %v3765_v7  ;;  %v2994_v7 = vld [vmem:[#allocation10 + $0xd0] ss:$8 sps:$4 sm:$0xff]  }
 0x1eb   :  { %1173 = vmatprep.mubr.bf16.mxu1 %v3507_v9  ;;  %1935 = vmatpush1.bf16.msra.mxu0 %v2994_v7 }
 0x1ec   :  { %1936 = vmatprep.subr.bf16.mxu0 %v2999_v2 }
 0x1ef   :  { %1937 = vmatpush1.bf16.msra.mxu0 %v2997_v39 }
 0x1f2   :  { %1174 = vmatmul.mubr.bf16.gmra.mrb[44].mxu1 %v3763_v6  ;;  %v3002_v6 = vld [vmem:[#allocation10 + $0xf4] ss:$8 sps:$4 sm:$0xff]  }
 0x1f3   :  { %1183 = vmatprep.mubr.bf16.mxu1 %v3507_v9  ;;  %1938 = vmatprep.subr.bf16.mxu0 %v3002_v6 }
 0x1f4   :  { %1939 = vmatpush1.bf16.msra.mxu0 %v3000_v41 }
 0x1f5   :  { %2021 = vmatprep.subr.bf16.mxu0 %v3005_v42 }
 0x1fa   :  { %1184 = vmatmul.mubr.bf16.gmra.mrb[48].mxu1 %v3781_v52  ;;  %v3878_v52 = vld [vmem:[#allocation10 + $0x1b4] ss:$8 sps:$4 sm:$0xff]  }
 0x1fb   :  { %1193 = vmatprep.mubr.bf16.mxu1 %v3507_v9 }
 0x202   :  { %1194 = vmatmul.mubr.bf16.gmra.mrb[52].mxu1 %v3779_v57  ;;  %v3866_v57 = vld [vmem:[#allocation10 + $0x194] ss:$8 sps:$4 sm:$0xff]  }
 0x203   :  { %1203 = vmatprep.mubr.bf16.mxu1 %v3507_v9 }
 0x20a   :  { %1204 = vmatmul.mubr.bf16.gmra.mrb[56].mxu1 %v3788_v17 }
 0x20b   :  { %1213 = vmatprep.mubr.bf16.mxu1 %v3507_v9  ;;  %v3836_v9 = vld [vmem:[#allocation10 + $0x144] ss:$8 sps:$4 sm:$0xff]  }
 0x20c   :  { %2779 = vmatprep.subr.bf16.mxu1 %v3836_v9 }
 0x20d   :  { %2795 = vmatpush1.bf16.msra.mxu1 %v3838_v46 }
 0x20e   :  { %2780 = vmatprep.subr.bf16.mxu1 %v3842_v47 }
 0x211   :  { %2796 = vmatpush1.bf16.msra.mxu1 %v3844_v37 }
 0x212   :  { %1214 = vmatmul.mubr.bf16.gmra.mrb[60].mxu1 %v3786_v16  ;;  %2781 = vmatprep.subr.bf16.mxu1 %v3848_v49 }
 0x215   :  { %2797 = vmatpush1.bf16.msra.mxu1 %v3850_v60 }
 0x216   :  { %2782 = vmatprep.subr.bf16.mxu1 %v3854_v26 }
 0x219   :  { %2798 = vmatpush1.bf16.msra.mxu1 %v3856_v13 }
 0x21a   :  { %2783 = vmatprep.subr.bf16.mxu1 %v3860_v53 }
 0x21d   :  { %2799 = vmatpush1.bf16.msra.mxu1 %v3862_v56 }
 0x21e   :  { %2784 = vmatprep.subr.bf16.mxu1 %v3866_v57 }
 0x221   :  { %2800 = vmatpush1.bf16.msra.mxu1 %v3868_v28 }
 0x222   :  { %2785 = vmatprep.subr.bf16.mxu1 %v3872_v32 }
 0x225   :  { %2801 = vmatpush1.bf16.msra.mxu1 %v3874_v59 }
 0x226   :  { %2786 = vmatprep.subr.bf16.mxu1 %v3878_v52 }
 0x229   :  { %2802 = vmatpush1.bf16.msra.mxu1 %v3880_v61 }
 0x22a   :  { %2787 = vmatprep.subr.bf16.mxu1 %v3884_v30 }
 0x22d   :  { %2803 = vmatpush1.bf16.msra.mxu1 %v3886_v38 }
 0x22e   :  { %2788 = vmatprep.subr.bf16.mxu1 %v3890_v27 }
 0x231   :  { %2804 = vmatpush1.bf16.msra.mxu1 %v3892_v51 }
 0x232   :  { %2789 = vmatprep.subr.bf16.mxu1 %v3896_v63 }
 0x235   :  { %2805 = vmatpush1.bf16.msra.mxu1 %v3898_v33 }
 0x236   :  { %2790 = vmatprep.subr.bf16.mxu1 %v3902_v0 }
 0x239   :  { %2806 = vmatpush1.bf16.msra.mxu1 %v3904_v3 }
 0x26d   :  { %v1032_v12 = vpop.f32.mrb[0].mxu1 }
 0x26e   :  { %v1033_v1 = vadd.f32 %v1032_v12, %v3924_v21  ;;  %v1034_v14 = vpop.f32.mrb[1].mxu1 }
 0x26f   :  { %v1035_v55 = vadd.f32 %v1034_v14, %v3928_v24  ;;  %v1036_v15 = vpop.f32.mrb[2].mxu1 }
 0x270   :  { %v1224_v16 = vmul.f32 0.5, %v1033_v1  ;;  %v1037_v17 = vadd.f32 %v1036_v15, %v3924_v21  ;;  %v1038_v48 = vpop.f32.mrb[3].mxu1 }
 0x271   :  { %v1225_v54 = vmul.f32 0.5, %v1035_v55  ;;  %v1039_v23 = vadd.f32 %v1038_v48, %v3928_v24 }
 0x272   :  { %3155 = vtanh.f32 %v1224_v16  ;;  %v1228_v18 = vmul.f32 0.5, %v1037_v17 }
 0x273   :  { %3157 = vtanh.f32 %v1225_v54  ;;  %v1229_v20 = vmul.f32 0.5, %v1039_v23 }
 0x274   :  { %3159 = vtanh.f32 %v1228_v18 }
 0x275   :  { %3161 = vtanh.f32 %v1229_v20  ;;  %v1042_v25 = vpop.f32.mrb[4].mxu1 }
 0x276   :  { %v1043_v29 = vadd.f32 %v1042_v25, %v3924_v21  ;;  %v1044_v62 = vpop.f32.mrb[5].mxu1 }
 0x277   :  { %v1045_v34 = vadd.f32 %v1044_v62, %v3928_v24  ;;  %v1046_v31 = vpop.f32.mrb[6].mxu1 }
 0x278   :  { %v1232_v19 = vmul.f32 0.5, %v1043_v29  ;;  %v1047_v50 = vadd.f32 %v1046_v31, %v3924_v21  ;;  %v1048_v36 = vpop.f32.mrb[7].mxu1 }
 0x279   :  { %v1233_v7 = vmul.f32 0.5, %v1045_v34  ;;  %v1049_v2 = vadd.f32 %v1048_v36, %v3928_v24 }
 0x27a   :  { %3163 = vtanh.f32 %v1232_v19  ;;  %v1236_v39 = vmul.f32 0.5, %v1047_v50 }
 0x27b   :  { %3165 = vtanh.f32 %v1233_v7  ;;  %v1237_v6 = vmul.f32 0.5, %v1049_v2 }
 0x27c   :  { %v3156_v41 = vpop.eup %3155  ;;  %3167 = vtanh.f32 %v1236_v39 }
 0x27d   :  { %v3158_v42 = vpop.eup %3157  ;;  %v1352_v12 = vmul.f32 0.5, %v3156_v41  ;;  %3169 = vtanh.f32 %v1237_v6  ;;  %v1052_v1 = vpop.f32.mrb[8].mxu1 }
 0x27e   :  { %v3160_v14 = vpop.eup %3159  ;;  %v1353_v55 = vmul.f32 0.5, %v3158_v42  ;;  %v1053_v15 = vadd.f32 %v1052_v1, %v3924_v21  ;;  %v1054_v16 = vpop.f32.mrb[9].mxu1 }
 0x27f   :  { %v3162_v17 = vpop.eup %3161  ;;  %v1356_v48 = vmul.f32 0.5, %v3160_v14  ;;  %v1055_v54 = vadd.f32 %v1054_v16, %v3928_v24  ;;  %v1056_v23 = vpop.f32.mrb[10].mxu1  ;;  %v1416_v62 = vadd.f32 0.5, %v1352_v12 }
 0x280   :  { %v1357_v18 = vmul.f32 0.5, %v3162_v17  ;;  %v1240_v20 = vmul.f32 0.5, %v1053_v15  ;;  %v1057_v25 = vadd.f32 %v1056_v23, %v3924_v21  ;;  %v1058_v29 = vpop.f32.mrb[11].mxu1  ;;  %v1417_v50 = vadd.f32 0.5, %v1353_v55 }
 0x281   :  { %v1420_v34 = vadd.f32 0.5, %v1356_v48  ;;  %v1241_v31 = vmul.f32 0.5, %v1055_v54  ;;  %v1059_v19 = vadd.f32 %v1058_v29, %v3928_v24 }
 0x282   :  { %v1421_v36 = vadd.f32 0.5, %v1357_v18  ;;  %3171 = vtanh.f32 %v1240_v20  ;;  %v1244_v7 = vmul.f32 0.5, %v1057_v25 }
 0x283   :  { %v1480_v2 = vpack.c.bf16 %v1420_v34, %v1416_v62  ;;  %3173 = vtanh.f32 %v1241_v31  ;;  %v1245_v39 = vmul.f32 0.5, %v1059_v19 }
 0x284   :  { %v3164_v6 = vpop.eup %3163  ;;  %3175 = vtanh.f32 %v1244_v7  ;;  %v1481_v41 = vpack.c.bf16 %v1421_v36, %v1417_v50 }
 0x285   :  { %v3166_v42 = vpop.eup %3165  ;;  %v1360_v1 = vmul.f32 0.5, %v3164_v6  ;;  %3177 = vtanh.f32 %v1245_v39  ;;  %v1062_v14 = vpop.f32.mrb[12].mxu1 }
 0x286   :  { %v3168_v15 = vpop.eup %3167  ;;  %v1361_v12 = vmul.f32 0.5, %v3166_v42  ;;  %v1063_v16 = vadd.f32 %v1062_v14, %v3924_v21  ;;  %v1064_v17 = vpop.f32.mrb[13].mxu1  ;;  %1940 = vmatprep.mubr.bf16.mxu0 %v1481_v41 }
 0x287   :  { %v3170_v55 = vpop.eup %3169  ;;  %v1364_v48 = vmul.f32 0.5, %v3168_v15  ;;  %v1065_v54 = vadd.f32 %v1064_v17, %v3928_v24  ;;  %v1066_v23 = vpop.f32.mrb[14].mxu1  ;;  %1941 = vmatmul.mubr.bf16.vlgmr.msra.gmra.mrb[32].mxu0 %v1480_v2  ;;  %v1424_v62 = vadd.f32 0.5, %v1360_v1 }
 0x288   :  { %v1365_v18 = vmul.f32 0.5, %v3170_v55  ;;  %v1248_v20 = vmul.f32 0.5, %v1063_v16  ;;  %v1067_v25 = vadd.f32 %v1066_v23, %v3924_v21  ;;  %v1068_v29 = vpop.f32.mrb[15].mxu1  ;;  %2022 = vmatpush1.bf16.msra.mxu0 %v3812_v40  ;;  %v1425_v50 = vadd.f32 0.5, %v1361_v12 }
 0x289   :  { %v1428_v34 = vadd.f32 0.5, %v1364_v48  ;;  %v1249_v31 = vmul.f32 0.5, %v1065_v54  ;;  %v1069_v19 = vadd.f32 %v1068_v29, %v3928_v24  ;;  %2023 = vmatprep.subr.bf16.mxu0 %v3815_v10 }
 0x28a   :  { %v1429_v36 = vadd.f32 0.5, %v1365_v18  ;;  %3179 = vtanh.f32 %v1248_v20  ;;  %v1252_v7 = vmul.f32 0.5, %v1067_v25 }
 0x28b   :  { %3181 = vtanh.f32 %v1249_v31  ;;  %v1253_v2 = vmul.f32 0.5, %v1069_v19  ;;  %v1484_v39 = vpack.c.bf16 %v1428_v34, %v1424_v62 }
 0x28c   :  { %v3172_v6 = vpop.eup %3171  ;;  %3183 = vtanh.f32 %v1252_v7  ;;  %2024 = vmatpush1.bf16.msra.mxu0 %v3818_v5  ;;  %v1485_v41 = vpack.c.bf16 %v1429_v36, %v1425_v50 }
 0x28d   :  { %v3174_v40 = vpop.eup %3173  ;;  %v1368_v42 = vmul.f32 0.5, %v3172_v6  ;;  %3185 = vtanh.f32 %v1253_v2  ;;  %v1072_v1 = vpop.f32.mrb[16].mxu1  ;;  %2025 = vmatprep.subr.bf16.mxu0 %v3823_v43 }
 0x28e   :  { %v3176_v14 = vpop.eup %3175  ;;  %v1369_v10 = vmul.f32 0.5, %v3174_v40  ;;  %v1073_v15 = vadd.f32 %v1072_v1, %v3924_v21  ;;  %v1074_v12 = vpop.f32.mrb[17].mxu1  ;;  %1950 = vmatprep.mubr.bf16.mxu0 %v1485_v41 }
 0x28f   :  { %v3178_v16 = vpop.eup %3177  ;;  %v1372_v17 = vmul.f32 0.5, %v3176_v14  ;;  %v1075_v55 = vadd.f32 %v1074_v12, %v3928_v24  ;;  %v1076_v48 = vpop.f32.mrb[18].mxu1  ;;  %1951 = vmatmul.mubr.bf16.gmra.mrb[36].mxu0 %v1484_v39  ;;  %v1432_v43 = vadd.f32 0.5, %v1368_v42 }
 0x290   :  { %v1373_v5 = vmul.f32 0.5, %v3178_v16  ;;  %v1256_v54 = vmul.f32 0.5, %v1073_v15  ;;  %v1077_v23 = vadd.f32 %v1076_v48, %v3924_v21  ;;  %v1078_v18 = vpop.f32.mrb[19].mxu1  ;;  %2026 = vmatpush1.bf16.msra.mxu0 %v3825_v11  ;;  %v1433_v62 = vadd.f32 0.5, %v1369_v10 }
 0x291   :  { %v1436_v20 = vadd.f32 0.5, %v1372_v17  ;;  %v1257_v25 = vmul.f32 0.5, %v1075_v55  ;;  %v1079_v29 = vadd.f32 %v1078_v18, %v3928_v24  ;;  %2027 = vmatprep.subr.bf16.mxu0 %v3829_v44 }
 0x292   :  { %v1437_v34 = vadd.f32 0.5, %v1373_v5  ;;  %3187 = vtanh.f32 %v1256_v54  ;;  %v1260_v31 = vmul.f32 0.5, %v1077_v23 }
 0x293   :  { %3189 = vtanh.f32 %v1257_v25  ;;  %v1261_v19 = vmul.f32 0.5, %v1079_v29  ;;  %v1488_v50 = vpack.c.bf16 %v1436_v20, %v1432_v43 }
 0x294   :  { %v3180_v36 = vpop.eup %3179  ;;  %3191 = vtanh.f32 %v1260_v31  ;;  %2028 = vmatpush1.bf16.msra.mxu0 %v3832_v45  ;;  %v1489_v7 = vpack.c.bf16 %v1437_v34, %v1433_v62 }
 0x295   :  { %v3182_v11 = vpop.eup %3181  ;;  %v1376_v2 = vmul.f32 0.5, %v3180_v36  ;;  %3193 = vtanh.f32 %v1261_v19  ;;  %v1082_v39 = vpop.f32.mrb[20].mxu1  ;;  %2029 = vmatprep.subr.bf16.mxu0 %v3836_v9 }
 0x296   :  { %v3184_v6 = vpop.eup %3183  ;;  %v1377_v44 = vmul.f32 0.5, %v3182_v11  ;;  %v1083_v41 = vadd.f32 %v1082_v39, %v3924_v21  ;;  %v1084_v40 = vpop.f32.mrb[21].mxu1  ;;  %1960 = vmatprep.mubr.bf16.mxu0 %v1489_v7 }
 0x297   :  { %v3186_v42 = vpop.eup %3185  ;;  %v1380_v1 = vmul.f32 0.5, %v3184_v6  ;;  %v1085_v14 = vadd.f32 %v1084_v40, %v3928_v24  ;;  %v1086_v10 = vpop.f32.mrb[22].mxu1  ;;  %1961 = vmatmul.mubr.bf16.gmra.mrb[40].mxu0 %v1488_v50  ;;  %v1440_v9 = vadd.f32 0.5, %v1376_v2 }
 0x298   :  { %v1381_v45 = vmul.f32 0.5, %v3186_v42  ;;  %v1264_v15 = vmul.f32 0.5, %v1083_v41  ;;  %v1087_v12 = vadd.f32 %v1086_v10, %v3924_v21  ;;  %v1088_v16 = vpop.f32.mrb[23].mxu1  ;;  %2030 = vmatpush1.bf16.msra.mxu0 %v3838_v46  ;;  %v1441_v5 = vadd.f32 0.5, %v1377_v44 }
 0x299   :  { %v1444_v17 = vadd.f32 0.5, %v1380_v1  ;;  %v1265_v55 = vmul.f32 0.5, %v1085_v14  ;;  %v1089_v48 = vadd.f32 %v1088_v16, %v3928_v24  ;;  %2031 = vmatprep.subr.bf16.mxu0 %v3842_v47 }
 0x29a   :  { %v1445_v54 = vadd.f32 0.5, %v1381_v45  ;;  %3195 = vtanh.f32 %v1264_v15  ;;  %v1268_v23 = vmul.f32 0.5, %v1087_v12 }
 0x29b   :  { %3197 = vtanh.f32 %v1265_v55  ;;  %v1269_v18 = vmul.f32 0.5, %v1089_v48  ;;  %v1492_v43 = vpack.c.bf16 %v1444_v17, %v1440_v9 }
 0x29c   :  { %v3188_v20 = vpop.eup %3187  ;;  %3199 = vtanh.f32 %v1268_v23  ;;  %2032 = vmatpush1.bf16.msra.mxu0 %v3844_v37  ;;  %v1493_v25 = vpack.c.bf16 %v1445_v54, %v1441_v5 }
 0x29d   :  { %v3190_v46 = vpop.eup %3189  ;;  %v1384_v29 = vmul.f32 0.5, %v3188_v20  ;;  %3201 = vtanh.f32 %v1269_v18  ;;  %v1092_v62 = vpop.f32.mrb[24].mxu1  ;;  %2033 = vmatprep.subr.bf16.mxu0 %v3848_v49 }
 0x29e   :  { %v3192_v34 = vpop.eup %3191  ;;  %v1385_v47 = vmul.f32 0.5, %v3190_v46  ;;  %v1093_v31 = vadd.f32 %v1092_v62, %v3924_v21  ;;  %v1094_v19 = vpop.f32.mrb[25].mxu1  ;;  %1970 = vmatprep.mubr.bf16.mxu0 %v1493_v25 }
 0x29f   :  { %v3194_v50 = vpop.eup %3193  ;;  %v1388_v36 = vmul.f32 0.5, %v3192_v34  ;;  %v1095_v7 = vadd.f32 %v1094_v19, %v3928_v24  ;;  %v1096_v11 = vpop.f32.mrb[26].mxu1  ;;  %1971 = vmatmul.mubr.bf16.gmra.mrb[44].mxu0 %v1492_v43  ;;  %v1448_v49 = vadd.f32 0.5, %v1384_v29  ;;  %v832_v43 = vsub.s32 3, %v3909_v58 }
 0x2a0   :  { %v1389_v37 = vmul.f32 0.5, %v3194_v50  ;;  %v1272_v2 = vmul.f32 0.5, %v1093_v31  ;;  %v1097_v39 = vadd.f32 %v1096_v11, %v3924_v21  ;;  %v1098_v6 = vpop.f32.mrb[27].mxu1  ;;  %2034 = vmatpush1.bf16.msra.mxu0 %v3850_v60  ;;  %v1449_v42 = vadd.f32 0.5, %v1385_v47 }
 0x2a1   :  { %v1452_v44 = vadd.f32 0.5, %v1388_v36  ;;  %v1273_v41 = vmul.f32 0.5, %v1095_v7  ;;  %v1099_v40 = vadd.f32 %v1098_v6, %v3928_v24  ;;  %2035 = vmatprep.subr.bf16.mxu0 %v3854_v26  ;;  %v828_v60 = vsub.s32 2, %v3909_v58 }
 0x2a2   :  { %v1453_v1 = vadd.f32 0.5, %v1389_v37  ;;  %3203 = vtanh.f32 %v1272_v2  ;;  %v1276_v14 = vmul.f32 0.5, %v1097_v39 }
 0x2a3   :  { %3205 = vtanh.f32 %v1273_v41  ;;  %v1277_v10 = vmul.f32 0.5, %v1099_v40  ;;  %v1496_v45 = vpack.c.bf16 %v1452_v44, %v1448_v49 }
 0x2a4   :  { %v3196_v15 = vpop.eup %3195  ;;  %3207 = vtanh.f32 %v1276_v14  ;;  %2036 = vmatpush1.bf16.msra.mxu0 %v3856_v13  ;;  %v1497_v12 = vpack.c.bf16 %v1453_v1, %v1449_v42 }
 0x2a5   :  { %v3198_v16 = vpop.eup %3197  ;;  %v1392_v9 = vmul.f32 0.5, %v3196_v15  ;;  %3209 = vtanh.f32 %v1277_v10  ;;  %v1102_v17 = vpop.f32.mrb[28].mxu1  ;;  %2037 = vmatprep.subr.bf16.mxu0 %v3860_v53  ;;  %v3981_v53 = vrot.slane %v3917_v35, %v828_v60 }
 0x2a6   :  { %v3200_v26 = vpop.eup %3199  ;;  %v1393_v55 = vmul.f32 0.5, %v3198_v16  ;;  %v1103_v48 = vadd.f32 %v1102_v17, %v3924_v21  ;;  %v1104_v5 = vpop.f32.mrb[29].mxu1  ;;  %1980 = vmatprep.mubr.bf16.mxu0 %v1497_v12 }
 0x2a7   :  { %v3202_v54 = vpop.eup %3201  ;;  %v1396_v23 = vmul.f32 0.5, %v3200_v26  ;;  %v1105_v18 = vadd.f32 %v1104_v5, %v3928_v24  ;;  %v1106_v13 = vpop.f32.mrb[30].mxu1  ;;  %1981 = vmatmul.mubr.bf16.gmra.mrb[48].mxu0 %v1496_v45  ;;  %v1456_v62 = vadd.f32 0.5, %v1392_v9 }
 0x2a8   :  { %v1397_v20 = vmul.f32 0.5, %v3202_v54  ;;  %v1280_v25 = vmul.f32 0.5, %v1103_v48  ;;  %v1107_v46 = vadd.f32 %v1106_v13, %v3924_v21  ;;  %v1108_v29 = vpop.f32.mrb[31].mxu1  ;;  %2038 = vmatpush1.bf16.msra.mxu0 %v3862_v56  ;;  %v1457_v19 = vadd.f32 0.5, %v1393_v55 }
 0x2a9   :  { %v1460_v34 = vadd.f32 0.5, %v1396_v23  ;;  %v1281_v47 = vmul.f32 0.5, %v1105_v18  ;;  %v1109_v31 = vadd.f32 %v1108_v29, %v3928_v24  ;;  %2039 = vmatprep.subr.bf16.mxu0 %v3866_v57  ;;  %v3986_v21 = vrot.slane %v3917_v35, %v832_v43 }
 0x2aa   :  { %v1461_v50 = vadd.f32 0.5, %v1397_v20  ;;  %3211 = vtanh.f32 %v1280_v25  ;;  %v1284_v36 = vmul.f32 0.5, %v1107_v46 }
 0x2ab   :  { %3213 = vtanh.f32 %v1281_v47  ;;  %v1285_v7 = vmul.f32 0.5, %v1109_v31  ;;  %v1500_v56 = vpack.c.bf16 %v1460_v34, %v1456_v62 }
 0x2ac   :  { %v3204_v11 = vpop.eup %3203  ;;  %3215 = vtanh.f32 %v1284_v36  ;;  %2040 = vmatpush1.bf16.msra.mxu0 %v3868_v28  ;;  %v1501_v37 = vpack.c.bf16 %v1461_v50, %v1457_v19 }
 0x2ad   :  { %v3206_v2 = vpop.eup %3205  ;;  %v1400_v39 = vmul.f32 0.5, %v3204_v11  ;;  %3217 = vtanh.f32 %v1285_v7  ;;  %v1145_v24 = vpop.f32.mrb[32].mxu1  ;;  %2041 = vmatprep.subr.bf16.mxu0 %v3872_v32 }
 0x2ae   :  { %v3208_v57 = vpop.eup %3207  ;;  %v1401_v6 = vmul.f32 0.5, %v3206_v2  ;;  %v1146_v49 = vadd.f32 %v1145_v24, %v3981_v53  ;;  %v1147_v44 = vpop.f32.mrb[33].mxu1  ;;  %1990 = vmatprep.mubr.bf16.mxu0 %v1501_v37 }
 0x2af   :  { %v3210_v35 = vpop.eup %3209  ;;  %v1404_v41 = vmul.f32 0.5, %v3208_v57  ;;  %v1148_v40 = vadd.f32 %v1147_v44, %v3986_v21  ;;  %v1149_v42 = vpop.f32.mrb[34].mxu1  ;;  %1991 = vmatmul.mubr.bf16.gmra.mrb[52].mxu0 %v1500_v56  ;;  %v1464_v32 = vadd.f32 0.5, %v1400_v39 }
 0x2b0   :  { %v1405_v28 = vmul.f32 0.5, %v3210_v35  ;;  %v1226_v1 = vmul.f32 0.5, %v1146_v49  ;;  %v1150_v14 = vadd.f32 %v1149_v42, %v3981_v53  ;;  %v1151_v10 = vpop.f32.mrb[35].mxu1  ;;  %2042 = vmatpush1.bf16.msra.mxu0 %v3874_v59  ;;  %v1465_v60 = vadd.f32 0.5, %v1401_v6 }
 0x2b1   :  { %v1468_v45 = vadd.f32 0.5, %v1404_v41  ;;  %v1227_v15 = vmul.f32 0.5, %v1148_v40  ;;  %v1152_v12 = vadd.f32 %v1151_v10, %v3986_v21  ;;  %2043 = vmatprep.subr.bf16.mxu0 %v3878_v52 }
 0x2b2   :  { %v1469_v16 = vadd.f32 0.5, %v1405_v28  ;;  %3219 = vtanh.f32 %v1226_v1  ;;  %v1230_v9 = vmul.f32 0.5, %v1150_v14 }
 0x2b3   :  { %3221 = vtanh.f32 %v1227_v15  ;;  %v1231_v17 = vmul.f32 0.5, %v1152_v12  ;;  %v1504_v26 = vpack.c.bf16 %v1468_v45, %v1464_v32 }
 0x2b4   :  { %v3212_v55 = vpop.eup %3211  ;;  %3223 = vtanh.f32 %v1230_v9  ;;  %2044 = vmatpush1.bf16.msra.mxu0 %v3880_v61  ;;  %v1505_v48 = vpack.c.bf16 %v1469_v16, %v1465_v60 }
 0x2b5   :  { %v3214_v59 = vpop.eup %3213  ;;  %v1408_v5 = vmul.f32 0.5, %v3212_v55  ;;  %3225 = vtanh.f32 %v1231_v17  ;;  %v1155_v54 = vpop.f32.mrb[36].mxu1  ;;  %2045 = vmatprep.subr.bf16.mxu0 %v3884_v30 }
 0x2b6   :  { %v3216_v23 = vpop.eup %3215  ;;  %v1409_v52 = vmul.f32 0.5, %v3214_v59  ;;  %v1156_v18 = vadd.f32 %v1155_v54, %v3981_v53  ;;  %v1157_v13 = vpop.f32.mrb[37].mxu1  ;;  %2000 = vmatprep.mubr.bf16.mxu0 %v1505_v48 }
 0x2b7   :  { %v3218_v43 = vpop.eup %3217  ;;  %v1412_v20 = vmul.f32 0.5, %v3216_v23  ;;  %v1158_v25 = vadd.f32 %v1157_v13, %v3986_v21  ;;  %v1159_v46 = vpop.f32.mrb[38].mxu1  ;;  %2001 = vmatmul.mubr.bf16.gmra.mrb[56].mxu0 %v1504_v26  ;;  %v1472_v30 = vadd.f32 0.5, %v1408_v5 }
 0x2b8   :  { %v1413_v61 = vmul.f32 0.5, %v3218_v43  ;;  %v1234_v29 = vmul.f32 0.5, %v1156_v18  ;;  %v1160_v62 = vadd.f32 %v1159_v46, %v3981_v53  ;;  %v1161_v34 = vpop.f32.mrb[39].mxu1  ;;  %2046 = vmatpush1.bf16.msra.mxu0 %v3886_v38  ;;  %v1473_v50 = vadd.f32 0.5, %v1409_v52 }
 0x2b9   :  { %v1476_v47 = vadd.f32 0.5, %v1412_v20  ;;  %v1235_v31 = vmul.f32 0.5, %v1158_v25  ;;  %v1162_v19 = vadd.f32 %v1161_v34, %v3986_v21  ;;  %2047 = vmatprep.subr.bf16.mxu0 %v3890_v27 }
 0x2ba   :  { %v1477_v36 = vadd.f32 0.5, %v1413_v61  ;;  %3227 = vtanh.f32 %v1234_v29  ;;  %v1238_v7 = vmul.f32 0.5, %v1160_v62 }
 0x2bb   :  { %3229 = vtanh.f32 %v1235_v31  ;;  %v1239_v56 = vmul.f32 0.5, %v1162_v19  ;;  %v1508_v11 = vpack.c.bf16 %v1476_v47, %v1472_v30 }
 0x2bc   :  { %v3220_v37 = vpop.eup %3219  ;;  %3231 = vtanh.f32 %v1238_v7  ;;  %2048 = vmatpush1.bf16.msra.mxu0 %v3892_v51  ;;  %v1509_v2 = vpack.c.bf16 %v1477_v36, %v1473_v50 }
 0x2bd   :  { %v3222_v38 = vpop.eup %3221  ;;  %v1354_v39 = vmul.f32 0.5, %v3220_v37  ;;  %3233 = vtanh.f32 %v1239_v56  ;;  %v1165_v24 = vpop.f32.mrb[40].mxu1  ;;  %2049 = vmatprep.subr.bf16.mxu0 %v3896_v63 }
 0x2be   :  { %v3224_v57 = vpop.eup %3223  ;;  %v1355_v27 = vmul.f32 0.5, %v3222_v38  ;;  %v1166_v6 = vadd.f32 %v1165_v24, %v3981_v53  ;;  %v1167_v49 = vpop.f32.mrb[41].mxu1  ;;  %2010 = vmatprep.mubr.bf16.mxu0 %v1509_v2 }
 0x2bf   :  { %v3226_v44 = vpop.eup %3225  ;;  %v1358_v35 = vmul.f32 0.5, %v3224_v57  ;;  %v1168_v41 = vadd.f32 %v1167_v49, %v3986_v21  ;;  %v1169_v40 = vpop.f32.mrb[42].mxu1  ;;  %2011 = vmatmul.mubr.bf16.gmra.mrb[60].mxu0 %v1508_v11  ;;  %v1418_v63 = vadd.f32 0.5, %v1354_v39 }
 0x2c0   :  { %v1359_v51 = vmul.f32 0.5, %v3226_v44  ;;  %v1242_v42 = vmul.f32 0.5, %v1166_v6  ;;  %v1170_v28 = vadd.f32 %v1169_v40, %v3981_v53  ;;  %v1171_v1 = vpop.f32.mrb[43].mxu1  ;;  %2050 = vmatpush1.bf16.msra.mxu0 %v3898_v33  ;;  %v1419_v45 = vadd.f32 0.5, %v1355_v27 }
 0x2c1   :  { %v1422_v14 = vadd.f32 0.5, %v1358_v35  ;;  %v1243_v10 = vmul.f32 0.5, %v1168_v41  ;;  %v1172_v32 = vadd.f32 %v1171_v1, %v3986_v21  ;;  %2051 = vmatprep.subr.bf16.mxu0 %v3902_v0 }
 0x2c2   :  { %v1423_v15 = vadd.f32 0.5, %v1359_v51  ;;  %3235 = vtanh.f32 %v1242_v42  ;;  %v1246_v12 = vmul.f32 0.5, %v1170_v28 }
 0x2c3   :  { %v1482_v60 = vpack.c.bf16 %v1422_v14, %v1418_v63  ;;  %3237 = vtanh.f32 %v1243_v10  ;;  %v1247_v16 = vmul.f32 0.5, %v1172_v32 }
 0x2c4   :  { %v3228_v9 = vpop.eup %3227  ;;  %3239 = vtanh.f32 %v1246_v12  ;;  %2052 = vmatpush1.bf16.msra.mxu0 %v3904_v3  ;;  %v1483_v17 = vpack.c.bf16 %v1423_v15, %v1419_v45 }
 0x2c5   :  { %v3230_v33 = vpop.eup %3229  ;;  %v1362_v26 = vmul.f32 0.5, %v3228_v9  ;;  %3241 = vtanh.f32 %v1247_v16  ;;  %v1175_v55 = vpop.f32.mrb[44].mxu1 }
 0x2c6   :  { %v3232_v48 = vpop.eup %3231  ;;  %v1363_v59 = vmul.f32 0.5, %v3230_v33  ;;  %v1176_v0 = vadd.f32 %v1175_v55, %v3981_v53  ;;  %v1177_v5 = vpop.f32.mrb[45].mxu1  ;;  %2053 = vmatprep.mubr.bf16.mxu0 %v1483_v17 }
 0x2c7   :  { %v3234_v54 = vpop.eup %3233  ;;  %v1366_v23 = vmul.f32 0.5, %v3232_v48  ;;  %v1178_v52 = vadd.f32 %v1177_v5, %v3986_v21  ;;  %v1179_v18 = vpop.f32.mrb[46].mxu1  ;;  %2054 = vmatmul.mubr.bf16.vlgmr.msra.gmra.mrb[32].mxu0 %v1482_v60  ;;  %v1426_v25 = vadd.f32 0.5, %v1362_v26 }
 0x2c8   :  { %v1367_v13 = vmul.f32 0.5, %v3234_v54  ;;  %v1250_v43 = vmul.f32 0.5, %v1176_v0  ;;  %v1180_v3 = vadd.f32 %v1179_v18, %v3981_v53  ;;  %v1181_v20 = vpop.f32.mrb[47].mxu1  ;;  %v1427_v62 = vadd.f32 0.5, %v1363_v59 }
 0x2c9   :  { %v1430_v46 = vadd.f32 0.5, %v1366_v23  ;;  %v1251_v61 = vmul.f32 0.5, %v1178_v52  ;;  %v1182_v29 = vadd.f32 %v1181_v20, %v3986_v21 }
 0x2ca   :  { %v1431_v34 = vadd.f32 0.5, %v1367_v13  ;;  %3243 = vtanh.f32 %v1250_v43  ;;  %v1254_v30 = vmul.f32 0.5, %v1180_v3 }
 0x2cb   :  { %3245 = vtanh.f32 %v1251_v61  ;;  %v1255_v47 = vmul.f32 0.5, %v1182_v29  ;;  %v1486_v31 = vpack.c.bf16 %v1430_v46, %v1426_v25 }
 0x2cc   :  { %v3236_v19 = vpop.eup %3235  ;;  %3247 = vtanh.f32 %v1254_v30  ;;  %v1487_v50 = vpack.c.bf16 %v1431_v34, %v1427_v62 }
 0x2cd   :  { %v3238_v36 = vpop.eup %3237  ;;  %v1370_v7 = vmul.f32 0.5, %v3236_v19  ;;  %3249 = vtanh.f32 %v1255_v47  ;;  %v1185_v56 = vpop.f32.mrb[48].mxu1 }
 0x2ce   :  { %v3240_v11 = vpop.eup %3239  ;;  %v1371_v37 = vmul.f32 0.5, %v3238_v36  ;;  %v1186_v2 = vadd.f32 %v1185_v56, %v3981_v53  ;;  %v1187_v38 = vpop.f32.mrb[49].mxu1  ;;  %2063 = vmatprep.mubr.bf16.mxu0 %v1487_v50 }
 0x2cf   :  { %v3242_v39 = vpop.eup %3241  ;;  %v1374_v24 = vmul.f32 0.5, %v3240_v11  ;;  %v1188_v57 = vadd.f32 %v1187_v38, %v3986_v21  ;;  %v1189_v27 = vpop.f32.mrb[50].mxu1  ;;  %2064 = vmatmul.mubr.bf16.gmra.mrb[36].mxu0 %v1486_v31  ;;  %v1434_v41 = vadd.f32 0.5, %v1370_v7 }
 0x2d0   :  { %v1375_v6 = vmul.f32 0.5, %v3242_v39  ;;  %v1258_v49 = vmul.f32 0.5, %v1186_v2  ;;  %v1190_v44 = vadd.f32 %v1189_v27, %v3981_v53  ;;  %v1191_v35 = vpop.f32.mrb[51].mxu1  ;;  %v1435_v28 = vadd.f32 0.5, %v1371_v37 }
 0x2d1   :  { %v1438_v40 = vadd.f32 0.5, %v1374_v24  ;;  %v1259_v51 = vmul.f32 0.5, %v1188_v57  ;;  %v1192_v42 = vadd.f32 %v1191_v35, %v3986_v21 }
 0x2d2   :  { %v1439_v1 = vadd.f32 0.5, %v1375_v6  ;;  %3251 = vtanh.f32 %v1258_v49  ;;  %v1262_v63 = vmul.f32 0.5, %v1190_v44 }
 0x2d3   :  { %v1490_v14 = vpack.c.bf16 %v1438_v40, %v1434_v41  ;;  %3253 = vtanh.f32 %v1259_v51  ;;  %v1263_v10 = vmul.f32 0.5, %v1192_v42 }
 0x2d4   :  { %v3244_v32 = vpop.eup %3243  ;;  %3255 = vtanh.f32 %v1262_v63  ;;  %v1491_v45 = vpack.c.bf16 %v1439_v1, %v1435_v28 }
 0x2d5   :  { %v3246_v15 = vpop.eup %3245  ;;  %v1378_v12 = vmul.f32 0.5, %v3244_v32  ;;  %3257 = vtanh.f32 %v1263_v10  ;;  %v1195_v60 = vpop.f32.mrb[52].mxu1 }
 0x2d6   :  { %v3248_v16 = vpop.eup %3247  ;;  %v1379_v9 = vmul.f32 0.5, %v3246_v15  ;;  %v1196_v17 = vadd.f32 %v1195_v60, %v3981_v53  ;;  %v1197_v33 = vpop.f32.mrb[53].mxu1  ;;  %2073 = vmatprep.mubr.bf16.mxu1 %v1491_v45 }
 0x2d7   :  { %v3250_v26 = vpop.eup %3249  ;;  %v1382_v55 = vmul.f32 0.5, %v3248_v16  ;;  %v1198_v48 = vadd.f32 %v1197_v33, %v3986_v21  ;;  %v1199_v59 = vpop.f32.mrb[54].mxu1  ;;  %2074 = vmatmul.mubr.bf16.vlgmr.msra.gmra.mrb[64].mxu1 %v1490_v14  ;;  %v1442_v52 = vadd.f32 0.5, %v1378_v12 }
 0x2d8   :  { %v1383_v0 = vmul.f32 0.5, %v3250_v26  ;;  %v1266_v5 = vmul.f32 0.5, %v1196_v17  ;;  %v1200_v54 = vadd.f32 %v1199_v59, %v3981_v53  ;;  %v1201_v23 = vpop.f32.mrb[55].mxu1  ;;  %v1443_v3 = vadd.f32 0.5, %v1379_v9 }
 0x2d9   :  { %v1446_v18 = vadd.f32 0.5, %v1382_v55  ;;  %v1267_v13 = vmul.f32 0.5, %v1198_v48  ;;  %v1202_v43 = vadd.f32 %v1201_v23, %v3986_v21 }
 0x2da   :  { %v1447_v20 = vadd.f32 0.5, %v1383_v0  ;;  %3259 = vtanh.f32 %v1266_v5  ;;  %v1270_v25 = vmul.f32 0.5, %v1200_v54 }
 0x2db   :  { %3261 = vtanh.f32 %v1267_v13  ;;  %v1271_v46 = vmul.f32 0.5, %v1202_v43  ;;  %v1494_v61 = vpack.c.bf16 %v1446_v18, %v1442_v52 }
 0x2dc   :  { %v3252_v29 = vpop.eup %3251  ;;  %3263 = vtanh.f32 %v1270_v25  ;;  %v1495_v62 = vpack.c.bf16 %v1447_v20, %v1443_v3 }
 0x2dd   :  { %v3254_v34 = vpop.eup %3253  ;;  %v1386_v30 = vmul.f32 0.5, %v3252_v29  ;;  %3265 = vtanh.f32 %v1271_v46  ;;  %v1205_v47 = vpop.f32.mrb[56].mxu1 }
 0x2de   :  { %v3256_v31 = vpop.eup %3255  ;;  %v1387_v19 = vmul.f32 0.5, %v3254_v34  ;;  %v1206_v50 = vadd.f32 %v1205_v47, %v3981_v53  ;;  %v1207_v36 = vpop.f32.mrb[57].mxu1  ;;  %2083 = vmatprep.mubr.bf16.mxu1 %v1495_v62 }
 0x2df   :  { %v3258_v7 = vpop.eup %3257  ;;  %v1390_v56 = vmul.f32 0.5, %v3256_v31  ;;  %v1208_v11 = vadd.f32 %v1207_v36, %v3986_v21  ;;  %v1209_v37 = vpop.f32.mrb[58].mxu1  ;;  %2084 = vmatmul.mubr.bf16.gmra.mrb[68].mxu1 %v1494_v61  ;;  %v1450_v57 = vadd.f32 0.5, %v1386_v30 }
 0x2e0   :  { %v1391_v2 = vmul.f32 0.5, %v3258_v7  ;;  %v1274_v38 = vmul.f32 0.5, %v1206_v50  ;;  %v1210_v39 = vadd.f32 %v1209_v37, %v3981_v53  ;;  %v1211_v24 = vpop.f32.mrb[59].mxu1  ;;  %v1451_v44 = vadd.f32 0.5, %v1387_v19 }
 0x2e1   :  { %v1454_v27 = vadd.f32 0.5, %v1390_v56  ;;  %v1275_v6 = vmul.f32 0.5, %v1208_v11  ;;  %v1212_v49 = vadd.f32 %v1211_v24, %v3986_v21 }
 0x2e2   :  { %v1455_v35 = vadd.f32 0.5, %v1391_v2  ;;  %3267 = vtanh.f32 %v1274_v38  ;;  %v1278_v41 = vmul.f32 0.5, %v1210_v39 }
 0x2e3   :  { %3269 = vtanh.f32 %v1275_v6  ;;  %v1279_v40 = vmul.f32 0.5, %v1212_v49  ;;  %v1498_v51 = vpack.c.bf16 %v1454_v27, %v1450_v57 }
 0x2e4   :  { %v3260_v42 = vpop.eup %3259  ;;  %3271 = vtanh.f32 %v1278_v41  ;;  %v1499_v28 = vpack.c.bf16 %v1455_v35, %v1451_v44 }
 0x2e5   :  { %v3262_v1 = vpop.eup %3261  ;;  %v1394_v63 = vmul.f32 0.5, %v3260_v42  ;;  %3273 = vtanh.f32 %v1279_v40  ;;  %v1215_v14 = vpop.f32.mrb[60].mxu1 }
 0x2e6   :  { %v3264_v10 = vpop.eup %3263  ;;  %v1395_v32 = vmul.f32 0.5, %v3262_v1  ;;  %v1216_v45 = vadd.f32 %v1215_v14, %v3981_v53  ;;  %v1217_v15 = vpop.f32.mrb[61].mxu1  ;;  %2093 = vmatprep.mubr.bf16.mxu1 %v1499_v28 }
 0x2e7   :  { %v3266_v12 = vpop.eup %3265  ;;  %v1398_v60 = vmul.f32 0.5, %v3264_v10  ;;  %v1218_v16 = vadd.f32 %v1217_v15, %v3986_v21  ;;  %v1219_v9 = vpop.f32.mrb[62].mxu1  ;;  %2094 = vmatmul.mubr.bf16.gmra.mrb[72].mxu1 %v1498_v51  ;;  %v1458_v48 = vadd.f32 0.5, %v1394_v63 }
 0x2e8   :  { %v1399_v17 = vmul.f32 0.5, %v3266_v12  ;;  %v1282_v33 = vmul.f32 0.5, %v1216_v45  ;;  %v1220_v26 = vadd.f32 %v1219_v9, %v3981_v53  ;;  %v1221_v55 = vpop.f32.mrb[63].mxu1  ;;  %v1459_v54 = vadd.f32 0.5, %v1395_v32 }
 0x2e9   :  { %v1462_v59 = vadd.f32 0.5, %v1398_v60  ;;  %v1283_v0 = vmul.f32 0.5, %v1218_v16  ;;  %v1222_v5 = vadd.f32 %v1221_v55, %v3986_v21 }
 0x2ea   :  { %v1463_v23 = vadd.f32 0.5, %v1399_v17  ;;  %3275 = vtanh.f32 %v1282_v33  ;;  %v1286_v52 = vmul.f32 0.5, %v1220_v26 }
 0x2eb   :  { %3277 = vtanh.f32 %v1283_v0  ;;  %v1287_v18 = vmul.f32 0.5, %v1222_v5  ;;  %v1502_v13 = vpack.c.bf16 %v1462_v59, %v1458_v48  ;;  %v1576_v0 = vld [vmem:[%s4262_s7] sm:$0x3] }
 0x2ec   :  { %v3268_v43 = vpop.eup %3267  ;;  %3279 = vtanh.f32 %v1286_v52  ;;  %v1503_v3 = vpack.c.bf16 %v1463_v23, %v1459_v54  ;;  %v4081_v5 = vrot.slane %v1576_v0, %v3912_v22  ;;  %v4084_v54 = vrot.slane %v1576_v0, %v3920_v8 }
 0x2ed   :  { %v3270_v20 = vpop.eup %3269  ;;  %v1402_v25 = vmul.f32 0.5, %v3268_v43  ;;  %3281 = vtanh.f32 %v1287_v18 }
 0x2ee   :  { %v3272_v53 = vpop.eup %3271  ;;  %v1403_v46 = vmul.f32 0.5, %v3270_v20  ;;  %2103 = vmatprep.mubr.bf16.mxu1 %v1503_v3 }
 0x2ef   :  { %v3274_v61 = vpop.eup %3273  ;;  %v1406_v29 = vmul.f32 0.5, %v3272_v53  ;;  %2104 = vmatmul.mubr.bf16.gmra.mrb[76].mxu1 %v1502_v13  ;;  %v1466_v62 = vadd.f32 0.5, %v1402_v25 }
 0x2f0   :  { %v1407_v21 = vmul.f32 0.5, %v3274_v61  ;;  %v1467_v30 = vadd.f32 0.5, %v1403_v46 }
 0x2f1   :  { %v1470_v34 = vadd.f32 0.5, %v1406_v29 }
 0x2f2   :  { %v1471_v47 = vadd.f32 0.5, %v1407_v21 }
 0x2f3   :  { %v1506_v31 = vpack.c.bf16 %v1470_v34, %v1466_v62 }
 0x2f4   :  { %v3276_v19 = vpop.eup %3275  ;;  %v1507_v50 = vpack.c.bf16 %v1471_v47, %v1467_v30 }
 0x2f5   :  { %v3278_v36 = vpop.eup %3277  ;;  %v1410_v7 = vmul.f32 0.5, %v3276_v19 }
 0x2f6   :  { %v3280_v56 = vpop.eup %3279  ;;  %v1411_v11 = vmul.f32 0.5, %v3278_v36  ;;  %2113 = vmatprep.mubr.bf16.mxu1 %v1507_v50 }
 0x2f7   :  { %v3282_v37 = vpop.eup %3281  ;;  %v1414_v2 = vmul.f32 0.5, %v3280_v56  ;;  %2114 = vmatmul.mubr.bf16.gmra.mrb[80].mxu1 %v1506_v31  ;;  %v1474_v39 = vadd.f32 0.5, %v1410_v7 }
 0x2f8   :  { %v1415_v38 = vmul.f32 0.5, %v3282_v37  ;;  %v1475_v57 = vadd.f32 0.5, %v1411_v11  ;;  %v2262_v11 = vld [vmem:[%s4263_s8] sm:$0x3] }
 0x2f9   :  { %v1478_v24 = vadd.f32 0.5, %v1414_v2 }
 0x2fa   :  { %v1479_v27 = vadd.f32 0.5, %v1415_v38 }
 0x2fb   :  { %v1510_v6 = vpack.c.bf16 %v1478_v24, %v1474_v39 }
 0x2fc   :  { %v1511_v49 = vpack.c.bf16 %v1479_v27, %v1475_v57 }
 0x2fe   :  { %2123 = vmatprep.mubr.bf16.mxu1 %v1511_v49 }
 0x2ff   :  { %2124 = vmatmul.mubr.bf16.gmra.mrb[84].mxu1 %v1510_v6  ;;  %v4100_v6 = vrot.slane %v2262_v11, %v3912_v22 }
 0x36a   :  { %v1962_v44 = vpop.f32.mrb[40].mxu0 }
 0x36b   :  { %v1964_v35 = vpop.f32.mrb[41].mxu0  ;;  %v1963_v38 = vadd.f32 %v1962_v44, %v4081_v5 }
 0x36c   :  { %v4033_v41 = vpop.f32.mrb[42].mxu0  ;;  %v1965_v24 = vadd.f32 %v1964_v35, %v4084_v54 }
 0x36d   :  { %v4035_v40 = vpop.f32.mrb[43].mxu0  ;;  %v1967_v0 = vadd.f32 %v4033_v41, %v4081_v5 }
 0x36e   :  { %v1969_v35 = vadd.f32 %v4035_v40, %v4084_v54 }
 0x372   :  { %v4037_v51 = vpop.f32.mrb[44].mxu0 }
 0x373   :  { %v4039_v42 = vpop.f32.mrb[45].mxu0 }
 0x374   :  { %v4041_v28 = vpop.f32.mrb[46].mxu0 }
 0x375   :  { %v4043_v1 = vpop.f32.mrb[47].mxu0 }
 0x37a   :  { %v4045_v63 = vpop.f32.mrb[48].mxu0 }
 0x37b   :  { %v4047_v14 = vpop.f32.mrb[49].mxu0 }
 0x37c   :  { %v4049_v10 = vpop.f32.mrb[50].mxu0 }
 0x37d   :  { %v4051_v32 = vpop.f32.mrb[51].mxu0 }
 0x382   :  { %v4053_v45 = vpop.f32.mrb[52].mxu0 }
 0x383   :  { %v4055_v15 = vpop.f32.mrb[53].mxu0 }
 0x384   :  { %v4057_v12 = vpop.f32.mrb[54].mxu0 }
 0x385   :  { %v4059_v60 = vpop.f32.mrb[55].mxu0 }
 0x38a   :  { %v4061_v16 = vpop.f32.mrb[56].mxu0 }
 0x38b   :  { %v4063_v9 = vpop.f32.mrb[57].mxu0 }
 0x38c   :  { %v4065_v17 = vpop.f32.mrb[58].mxu0 }
 0x38d   :  { %v4067_v33 = vpop.f32.mrb[59].mxu0 }
 0x392   :  { %v4069_v26 = vpop.f32.mrb[60].mxu0 }
 0x393   :  { %v4071_v55 = vpop.f32.mrb[61].mxu0 }
 0x394   :  { %v4073_v48 = vpop.f32.mrb[62].mxu0 }
 0x395   :  { %v4075_v59 = vpop.f32.mrb[63].mxu0 }
 0x39a   :  { %v2055_v23 = vpop.f32.mrb[32].mxu0 }
 0x39b   :  { %v2807_v52 = vadd.f32 %v2055_v23, %v4081_v5  ;;  %v2057_v18 = vpop.f32.mrb[33].mxu0 }
 0x39c   :  { %v2808_v13 = vadd.f32 %v2057_v18, %v4084_v54  ;;  %v2059_v43 = vpop.f32.mrb[34].mxu0 }
 0x39d   :  { %v2134_v3 = vmul.f32 0.5, %v2807_v52  ;;  %v2809_v20 = vadd.f32 %v2059_v43, %v4081_v5  ;;  %v2061_v25 = vpop.f32.mrb[35].mxu0 }
 0x39e   :  { %v2135_v53 = vmul.f32 0.5, %v2808_v13  ;;  %v2810_v46 = vadd.f32 %v2061_v25, %v4084_v54  ;;  %v4105_v13 = vrot.slane %v2262_v11, %v3920_v8  ;;  %v1975_v11 = vadd.f32 %v4039_v42, %v4084_v54 }
 0x39f   :  { %3283 = vtanh.f32 %v2134_v3  ;;  %v2136_v61 = vmul.f32 0.5, %v2809_v20 }
 0x3a0   :  { %3285 = vtanh.f32 %v2135_v53  ;;  %v2137_v29 = vmul.f32 0.5, %v2810_v46 }
 0x3a1   :  { %3287 = vtanh.f32 %v2136_v61 }
 0x3a2   :  { %3289 = vtanh.f32 %v2137_v29  ;;  %v2065_v21 = vpop.f32.mrb[36].mxu0 }
 0x3a3   :  { %v2811_v62 = vadd.f32 %v2065_v21, %v4081_v5  ;;  %v2067_v34 = vpop.f32.mrb[37].mxu0 }
 0x3a4   :  { %v2812_v30 = vadd.f32 %v2067_v34, %v4084_v54  ;;  %v2069_v47 = vpop.f32.mrb[38].mxu0 }
 0x3a5   :  { %v2138_v31 = vmul.f32 0.5, %v2811_v62  ;;  %v2813_v19 = vadd.f32 %v2069_v47, %v4081_v5  ;;  %v2071_v50 = vpop.f32.mrb[39].mxu0 }
 0x3a6   :  { %v2139_v36 = vmul.f32 0.5, %v2812_v30  ;;  %v2814_v7 = vadd.f32 %v2071_v50, %v4084_v54  ;;  %v1973_v50 = vadd.f32 %v4037_v51, %v4081_v5 }
 0x3a7   :  { %3291 = vtanh.f32 %v2138_v31  ;;  %v2140_v56 = vmul.f32 0.5, %v2813_v19 }
 0x3a8   :  { %3293 = vtanh.f32 %v2139_v36  ;;  %v2141_v37 = vmul.f32 0.5, %v2814_v7 }
 0x3a9   :  { %v3284_v2 = vpop.eup %3283  ;;  %3295 = vtanh.f32 %v2140_v56 }
 0x3aa   :  { %v3286_v39 = vpop.eup %3285  ;;  %v2198_v57 = vmul.f32 0.5, %v3284_v2  ;;  %3297 = vtanh.f32 %v2141_v37  ;;  %v2075_v27 = vpop.f32.mrb[64].mxu1 }
 0x3ab   :  { %v3288_v49 = vpop.eup %3287  ;;  %v2199_v23 = vmul.f32 0.5, %v3286_v39  ;;  %v2076_v52 = vadd.f32 %v2075_v27, %v1963_v38  ;;  %v2077_v18 = vpop.f32.mrb[65].mxu1  ;;  %v1977_v39 = vadd.f32 %v4041_v28, %v4081_v5 }
 0x3ac   :  { %v3290_v44 = vpop.eup %3289  ;;  %v2230_v43 = vadd.f32 0.5, %v2198_v57  ;;  %v2200_v3 = vmul.f32 0.5, %v3288_v49  ;;  %v2078_v20 = vadd.f32 %v2077_v18, %v1965_v24  ;;  %v2079_v25 = vpop.f32.mrb[66].mxu1 }
 0x3ad   :  { %v2231_v22 = vadd.f32 0.5, %v2199_v23  ;;  %v2201_v53 = vmul.f32 0.5, %v3290_v44  ;;  %v2142_v46 = vmul.f32 0.5, %v2076_v52  ;;  %v2080_v61 = vadd.f32 %v2079_v25, %v1967_v0  ;;  %v2081_v29 = vpop.f32.mrb[67].mxu1 }
 0x3ae   :  { %v2232_v41 = vadd.f32 0.5, %v2200_v3  ;;  %v2143_v21 = vmul.f32 0.5, %v2078_v20  ;;  %v2082_v62 = vadd.f32 %v2081_v29, %v1969_v35  ;;  %v2274_v34 = vmul.f32 %v4100_v6, %v2230_v43 }
 0x3af   :  { %v2233_v8 = vadd.f32 0.5, %v2201_v53  ;;  %3299 = vtanh.f32 %v2142_v46  ;;  %v2144_v30 = vmul.f32 0.5, %v2080_v61  ;;  %v2275_v47 = vmul.f32 %v4105_v13, %v2231_v22 }
 0x3b0   :  { %3301 = vtanh.f32 %v2143_v21  ;;  %v2145_v40 = vmul.f32 0.5, %v2082_v62  ;;  %v2276_v31 = vmul.f32 %v4100_v6, %v2232_v41  ;;  %v1979_v0 = vadd.f32 %v4043_v1, %v4084_v54 }
 0x3b1   :  { %v3292_v19 = vpop.eup %3291  ;;  %3303 = vtanh.f32 %v2144_v30  ;;  %v2306_v36 = vadd.f32 %v2275_v47, %v2274_v34  ;;  %v2277_v7 = vmul.f32 %v4105_v13, %v2233_v8  ;;  %v1983_v62 = vadd.f32 %v4045_v63, %v4081_v5 }
 0x3b2   :  { %v3294_v56 = vpop.eup %3293  ;;  %v2202_v37 = vmul.f32 0.5, %v3292_v19  ;;  %3305 = vtanh.f32 %v2145_v40  ;;  %v2085_v2 = vpop.f32.mrb[68].mxu1  ;;  %v1985_v47 = vadd.f32 %v4047_v14, %v4084_v54 }
 0x3b3   :  { %v3296_v38 = vpop.eup %3295  ;;  %v2203_v24 = vmul.f32 0.5, %v3294_v56  ;;  %v2086_v57 = vadd.f32 %v2085_v2, %v1973_v50  ;;  %v2087_v27 = vpop.f32.mrb[69].mxu1  ;;  %2307 = vadd.xlane.f32.xlu0 %v2306_v36  ;;  %v2309_v51 = vadd.f32 %v2277_v7, %v2276_v31  ;;  %v1987_v50 = vadd.f32 %v4049_v10, %v4081_v5 }
 0x3b4   :  { %v3298_v49 = vpop.eup %3297  ;;  %v2234_v23 = vadd.f32 0.5, %v2202_v37  ;;  %v2204_v52 = vmul.f32 0.5, %v3296_v38  ;;  %v2088_v18 = vadd.f32 %v2087_v27, %v1975_v11  ;;  %v2089_v42 = vpop.f32.mrb[70].mxu1  ;;  %v1989_v37 = vadd.f32 %v4051_v32, %v4084_v54 }
 0x3b5   :  { %v2235_v44 = vadd.f32 0.5, %v2203_v24  ;;  %v2205_v35 = vmul.f32 0.5, %v3298_v49  ;;  %v2146_v43 = vmul.f32 0.5, %v2086_v57  ;;  %v2090_v3 = vadd.f32 %v2089_v42, %v1977_v39  ;;  %v2091_v20 = vpop.f32.mrb[71].mxu1  ;;  %2310 = vadd.xlane.f32.xlu1 %v2309_v51 }
 0x3b6   :  { %v2236_v28 = vadd.f32 0.5, %v2204_v52  ;;  %v2147_v25 = vmul.f32 0.5, %v2088_v18  ;;  %v2092_v22 = vadd.f32 %v2091_v20, %v1979_v0  ;;  %v2278_v53 = vmul.f32 %v4100_v6, %v2234_v23 }
 0x3b7   :  { %v2237_v46 = vadd.f32 0.5, %v2205_v35  ;;  %3307 = vtanh.f32 %v2146_v43  ;;  %v2148_v61 = vmul.f32 0.5, %v2090_v3  ;;  %v2279_v1 = vmul.f32 %v4105_v13, %v2235_v44 }
 0x3b8   :  { %3309 = vtanh.f32 %v2147_v25  ;;  %v2149_v29 = vmul.f32 0.5, %v2092_v22  ;;  %v2280_v41 = vmul.f32 %v4100_v6, %v2236_v28  ;;  %v1993_v3 = vadd.f32 %v4053_v45, %v4081_v5 }
 0x3b9   :  { %v3300_v21 = vpop.eup %3299  ;;  %3311 = vtanh.f32 %v2148_v61  ;;  %v2312_v34 = vadd.f32 %v2279_v1, %v2278_v53  ;;  %v2281_v8 = vmul.f32 %v4105_v13, %v2237_v46  ;;  %v1995_v22 = vadd.f32 %v4055_v15, %v4084_v54 }
 0x3ba   :  { %v3302_v30 = vpop.eup %3301  ;;  %v2206_v40 = vmul.f32 0.5, %v3300_v21  ;;  %3313 = vtanh.f32 %v2149_v29  ;;  %v2095_v31 = vpop.f32.mrb[72].mxu1  ;;  %v1997_v1 = vadd.f32 %v4057_v12, %v4081_v5 }
 0x3bb   :  { %v3304_v19 = vpop.eup %3303  ;;  %v2207_v36 = vmul.f32 0.5, %v3302_v30  ;;  %v2096_v7 = vadd.f32 %v2095_v31, %v1983_v62  ;;  %v2097_v56 = vpop.f32.mrb[73].mxu1  ;;  %2313 = vadd.xlane.f32.xlu0 %v2312_v34  ;;  %v2315_v63 = vadd.f32 %v2281_v8, %v2280_v41  ;;  %v1999_v34 = vadd.f32 %v4059_v60, %v4084_v54 }
 0x3bc   :  { %v3306_v11 = vpop.eup %3305  ;;  %v2238_v2 = vadd.f32 0.5, %v2206_v40  ;;  %v2208_v38 = vmul.f32 0.5, %v3304_v19  ;;  %v2098_v39 = vadd.f32 %v2097_v56, %v1985_v47  ;;  %v2099_v14 = vpop.f32.mrb[74].mxu1 }
 0x3bd   :  { %v2239_v24 = vadd.f32 0.5, %v2207_v36  ;;  %v2209_v57 = vmul.f32 0.5, %v3306_v11  ;;  %v2150_v27 = vmul.f32 0.5, %v2096_v7  ;;  %v2100_v51 = vadd.f32 %v2099_v14, %v1987_v50  ;;  %v2101_v49 = vpop.f32.mrb[75].mxu1  ;;  %2316 = vadd.xlane.f32.xlu1 %v2315_v63 }
 0x3be   :  { %v2240_v10 = vadd.f32 0.5, %v2208_v38  ;;  %v2151_v0 = vmul.f32 0.5, %v2098_v39  ;;  %v2102_v23 = vadd.f32 %v2101_v49, %v1989_v37  ;;  %v2282_v52 = vmul.f32 %v4100_v6, %v2238_v2 }
 0x3bf   :  { %v2241_v18 = vadd.f32 0.5, %v2209_v57  ;;  %3315 = vtanh.f32 %v2150_v27  ;;  %v2152_v42 = vmul.f32 0.5, %v2100_v51  ;;  %v2283_v32 = vmul.f32 %v4105_v13, %v2239_v24 }
 0x3c0   :  { %3317 = vtanh.f32 %v2151_v0  ;;  %v2153_v44 = vmul.f32 0.5, %v2102_v23  ;;  %v2284_v35 = vmul.f32 %v4100_v6, %v2240_v10  ;;  %v2003_v14 = vadd.f32 %v4061_v16, %v4081_v5 }
 0x3c1   :  { %v3308_v43 = vpop.eup %3307  ;;  %3319 = vtanh.f32 %v2152_v42  ;;  %v2318_v20 = vadd.f32 %v2283_v32, %v2282_v52  ;;  %v2285_v28 = vmul.f32 %v4105_v13, %v2241_v18  ;;  %v2005_v51 = vadd.f32 %v4063_v9, %v4084_v54 }
 0x3c2   :  { %v3310_v25 = vpop.eup %3309  ;;  %v2210_v53 = vmul.f32 0.5, %v3308_v43  ;;  %3321 = vtanh.f32 %v2153_v44  ;;  %v2105_v46 = vpop.f32.mrb[76].mxu1  ;;  %v2007_v23 = vadd.f32 %v4065_v17, %v4081_v5  ;;  %v2009_v44 = vadd.f32 %v4067_v33, %v4084_v54 }
 0x3c3   :  { %v3312_v61 = vpop.eup %3311  ;;  %v2211_v29 = vmul.f32 0.5, %v3310_v25  ;;  %v2106_v41 = vadd.f32 %v2105_v46, %v1993_v3  ;;  %v2107_v21 = vpop.f32.mrb[77].mxu1  ;;  %2319 = vadd.xlane.f32.xlu0 %v2318_v20  ;;  %v2321_v45 = vadd.f32 %v2285_v28, %v2284_v35 }
 0x3c4   :  { %v3314_v62 = vpop.eup %3313  ;;  %v2242_v8 = vadd.f32 0.5, %v2210_v53  ;;  %v2212_v30 = vmul.f32 0.5, %v3312_v61  ;;  %v2108_v47 = vadd.f32 %v2107_v21, %v1995_v22  ;;  %v2109_v15 = vpop.f32.mrb[78].mxu1 }
 0x3c5   :  { %v2243_v40 = vadd.f32 0.5, %v2211_v29  ;;  %v2213_v31 = vmul.f32 0.5, %v3314_v62  ;;  %v2154_v19 = vmul.f32 0.5, %v2106_v41  ;;  %v2110_v50 = vadd.f32 %v2109_v15, %v1997_v1  ;;  %v2111_v36 = vpop.f32.mrb[79].mxu1  ;;  %2322 = vadd.xlane.f32.xlu1 %v2321_v45 }
 0x3c6   :  { %v2244_v12 = vadd.f32 0.5, %v2212_v30  ;;  %v2155_v7 = vmul.f32 0.5, %v2108_v47  ;;  %v2112_v56 = vadd.f32 %v2111_v36, %v1999_v34  ;;  %v2286_v63 = vmul.f32 %v4100_v6, %v2242_v8 }
 0x3c7   :  { %v2245_v11 = vadd.f32 0.5, %v2213_v31  ;;  %3323 = vtanh.f32 %v2154_v19  ;;  %v2156_v37 = vmul.f32 0.5, %v2110_v50  ;;  %v2287_v60 = vmul.f32 %v4105_v13, %v2243_v40 }
 0x3c8   :  { %3325 = vtanh.f32 %v2155_v7  ;;  %v2157_v2 = vmul.f32 0.5, %v2112_v56  ;;  %v2288_v38 = vmul.f32 %v4100_v6, %v2244_v12  ;;  %v2013_v34 = vadd.f32 %v4069_v26, %v4081_v5 }
 0x3c9   :  { %v3316_v39 = vpop.eup %3315  ;;  %3327 = vtanh.f32 %v2156_v37  ;;  %v2324_v24 = vadd.f32 %v2287_v60, %v2286_v63  ;;  %v2289_v57 = vmul.f32 %v4105_v13, %v2245_v11  ;;  %v2015_v15 = vadd.f32 %v4071_v55, %v4084_v54 }
 0x3ca   :  { %v3318_v27 = vpop.eup %3317  ;;  %v2214_v49 = vmul.f32 0.5, %v3316_v39  ;;  %3329 = vtanh.f32 %v2157_v2  ;;  %v2115_v10 = vpop.f32.mrb[80].mxu1  ;;  %v2017_v50 = vadd.f32 %v4073_v48, %v4081_v5  ;;  %v2019_v63 = vadd.f32 %v4075_v59, %v4084_v54 }
 0x3cb   :  { %v3320_v0 = vpop.eup %3319  ;;  %v2215_v52 = vmul.f32 0.5, %v3318_v27  ;;  %v2116_v18 = vadd.f32 %v2115_v10, %v2003_v14  ;;  %v2117_v42 = vpop.f32.mrb[81].mxu1  ;;  %2325 = vadd.xlane.f32.xlu0 %v2324_v24  ;;  %v2327_v16 = vadd.f32 %v2289_v57, %v2288_v38 }
 0x3cc   :  { %v3322_v32 = vpop.eup %3321  ;;  %v2246_v35 = vadd.f32 0.5, %v2214_v49  ;;  %v2216_v43 = vmul.f32 0.5, %v3320_v0  ;;  %v2118_v3 = vadd.f32 %v2117_v42, %v2005_v51  ;;  %v2119_v9 = vpop.f32.mrb[82].mxu1 }
 0x3cd   :  { %v2247_v20 = vadd.f32 0.5, %v2215_v52  ;;  %v2217_v28 = vmul.f32 0.5, %v3322_v32  ;;  %v2158_v25 = vmul.f32 0.5, %v2116_v18  ;;  %v2120_v22 = vadd.f32 %v2119_v9, %v2007_v23  ;;  %v2121_v53 = vpop.f32.mrb[83].mxu1  ;;  %2328 = vadd.xlane.f32.xlu1 %v2327_v16 }
 0x3ce   :  { %v2248_v17 = vadd.f32 0.5, %v2216_v43  ;;  %v2159_v46 = vmul.f32 0.5, %v2118_v3  ;;  %v2122_v61 = vadd.f32 %v2121_v53, %v2009_v44  ;;  %v2290_v1 = vmul.f32 %v4100_v6, %v2246_v35 }
 0x3cf   :  { %v2249_v29 = vadd.f32 0.5, %v2217_v28  ;;  %3331 = vtanh.f32 %v2158_v25  ;;  %v2160_v41 = vmul.f32 0.5, %v2120_v22  ;;  %v2291_v33 = vmul.f32 %v4105_v13, %v2247_v20 }
 0x3d0   :  { %3333 = vtanh.f32 %v2159_v46  ;;  %v2161_v21 = vmul.f32 0.5, %v2122_v61  ;;  %v2292_v45 = vmul.f32 %v4100_v6, %v2248_v17 }
 0x3d1   :  { %v3324_v62 = vpop.eup %3323  ;;  %3335 = vtanh.f32 %v2160_v41  ;;  %v2330_v8 = vadd.f32 %v2291_v33, %v2290_v1  ;;  %v2293_v30 = vmul.f32 %v4105_v13, %v2249_v29 }
 0x3d2   :  { %v3326_v47 = vpop.eup %3325  ;;  %v2218_v40 = vmul.f32 0.5, %v3324_v62  ;;  %3337 = vtanh.f32 %v2161_v21  ;;  %v2125_v31 = vpop.f32.mrb[84].mxu1 }
 0x3d3   :  { %v3328_v19 = vpop.eup %3327  ;;  %v2219_v36 = vmul.f32 0.5, %v3326_v47  ;;  %v2126_v12 = vadd.f32 %v2125_v31, %v2013_v34  ;;  %v2127_v7 = vpop.f32.mrb[85].mxu1  ;;  %2331 = vadd.xlane.f32.xlu0 %v2330_v8  ;;  %v2333_v26 = vadd.f32 %v2293_v30, %v2292_v45 }
 0x3d4   :  { %v3330_v56 = vpop.eup %3329  ;;  %v2250_v11 = vadd.f32 0.5, %v2218_v40  ;;  %v2220_v37 = vmul.f32 0.5, %v3328_v19  ;;  %v2128_v60 = vadd.f32 %v2127_v7, %v2015_v15  ;;  %v2129_v55 = vpop.f32.mrb[86].mxu1 }
 0x3d5   :  { %v2251_v2 = vadd.f32 0.5, %v2219_v36  ;;  %v2221_v38 = vmul.f32 0.5, %v3330_v56  ;;  %v2162_v39 = vmul.f32 0.5, %v2126_v12  ;;  %v2130_v14 = vadd.f32 %v2129_v55, %v2017_v50  ;;  %v2131_v24 = vpop.f32.mrb[87].mxu1  ;;  %2334 = vadd.xlane.f32.xlu1 %v2333_v26 }
 0x3d6   :  { %v2252_v48 = vadd.f32 0.5, %v2220_v37  ;;  %v2163_v5 = vmul.f32 0.5, %v2128_v60  ;;  %v2132_v57 = vadd.f32 %v2131_v24, %v2019_v63  ;;  %v2294_v27 = vmul.f32 %v4100_v6, %v2250_v11 }
 0x3d7   :  { %v2253_v51 = vadd.f32 0.5, %v2221_v38  ;;  %3339 = vtanh.f32 %v2162_v39  ;;  %v2164_v49 = vmul.f32 0.5, %v2130_v14  ;;  %v2295_v59 = vmul.f32 %v4105_v13, %v2251_v2 }
 0x3d8   :  { %3341 = vtanh.f32 %v2163_v5  ;;  %v2165_v54 = vmul.f32 0.5, %v2132_v57  ;;  %v2296_v10 = vmul.f32 %v4100_v6, %v2252_v48  ;;  %v4184_v11 = vstv %s4264_s9  ;;  %s3508_s9 = smov [#allocation12]  }
 0x3d9   :  { %v3332_v0 = vpop.eup %3331  ;;  %3343 = vtanh.f32 %v2164_v49  ;;  %v2336_v23 = vadd.f32 %v2295_v59, %v2294_v27  ;;  %v2297_v52 = vmul.f32 %v4105_v13, %v2253_v51  ;;  %s2571_s16 = sshll.u32 %s3508_s9, 4  ;;  %s2572_s16 = int_to_ptr.vmem [resolvable:$true] %s2571_s16 }
 0x3da   :  { %v3334_v18 = vpop.eup %3333  ;;  %v2222_v42 = vmul.f32 0.5, %v3332_v0  ;;  %3345 = vtanh.f32 %v2165_v54  ;;  %s3467_s25 = scalar_lea.vmem %s2572_s16, 16  ;;  %s3471_s26 = scalar_lea.vmem %s2572_s16, 32 }
 0x3db   :  { %v3336_v16 = vpop.eup %3335  ;;  %v2223_v32 = vmul.f32 0.5, %v3334_v18  ;;  %2337 = vadd.xlane.f32.xlu0 %v2336_v23  ;;  %v2339_v44 = vadd.f32 %v2297_v52, %v2296_v10  ;;  %v4196_v18 = vand.u32 127, %v818_v4  ;;  %p3468_p4 = scmp.ne.s32.totalorder %s2572_s16, %s3467_s25  ;;  %p3472_p5 = scmp.lt.s32.totalorder %s2572_s16, %s2572_s16 }
 0x3dc   :  { %v3338_v35 = vpop.eup %3337  ;;  %v2254_v43 = vadd.f32 0.5, %v2222_v42  ;;  %v2224_v3 = vmul.f32 0.5, %v3336_v16  ;;  %p3473_p6 = scmp.lt.s32.totalorder %s3471_s26, %s3467_s25 }
 0x3dd   :  { %v2255_v9 = vadd.f32 0.5, %v2223_v32  ;;  %v2225_v20 = vmul.f32 0.5, %v3338_v35  ;;  %2340 = vadd.xlane.f32.xlu1 %v2339_v44 }
 0x3de   :  { %v2256_v28 = vadd.f32 0.5, %v2224_v3  ;;  %v2298_v25 = vmul.f32 %v4100_v6, %v2254_v43  ;;  %v2458_v3 = vadd.s32 4294967288, %v4196_v18  ;;  %p3474_p7 = por %p3473_p6, %p3472_p5 }
 0x3df   :  { %v2257_v22 = vadd.f32 0.5, %v2225_v20  ;;  %v2299_v53 = vmul.f32 %v4105_v13, %v2255_v9  ;;  %v2465_v20 = vadd.s32 4294967280, %v4196_v18 }
 0x3e0   :  { %v2300_v17 = vmul.f32 %v4100_v6, %v2256_v28  ;;  %p3475_p8 = pnand %p3474_p7, %p3468_p4 }
 0x3e1   :  { %v3340_v46 = vpop.eup %3339  ;;  %v2342_v61 = vadd.f32 %v2299_v53, %v2298_v25  ;;  %v2301_v1 = vmul.f32 %v4105_v13, %v2257_v22 }
 0x3e2   :  { %v3342_v29 = vpop.eup %3341  ;;  %v2226_v41 = vmul.f32 0.5, %v3340_v46 }
 0x3e3   :  { %v3344_v33 = vpop.eup %3343  ;;  %v2227_v21 = vmul.f32 0.5, %v3342_v29  ;;  %2343 = vadd.xlane.f32.xlu0 %v2342_v61  ;;  %v2345_v45 = vadd.f32 %v2301_v1, %v2300_v17  ;;  %v2461_v1 = vsub.s32 %v2458_v3, %v3909_v58 }
 0x3e4   :  { %v3346_v62 = vpop.eup %3345  ;;  %v2258_v34 = vadd.f32 0.5, %v2226_v41  ;;  %v2228_v8 = vmul.f32 0.5, %v3344_v33  ;;  %v2468_v41 = vsub.s32 %v2465_v20, %v3909_v58  ;;  %v2472_v33 = vadd.s32 4294967272, %v4196_v18 }
 0x3e5   :  { %v2259_v30 = vadd.f32 0.5, %v2227_v21  ;;  %v2229_v47 = vmul.f32 0.5, %v3346_v62  ;;  %2346 = vadd.xlane.f32.xlu1 %v2345_v45 }
 0x3e6   :  { %v2260_v15 = vadd.f32 0.5, %v2228_v8  ;;  %v2302_v40 = vmul.f32 %v4100_v6, %v2258_v34  ;;  %v2479_v8 = vadd.s32 4294967264, %v4196_v18 }
 0x3e7   :  { %v2261_v31 = vadd.f32 0.5, %v2229_v47  ;;  %v2303_v19 = vmul.f32 %v4105_v13, %v2259_v30 }
 0x3e8   :  { %v2304_v50 = vmul.f32 %v4100_v6, %v2260_v15 }
 0x3e9   :  { %v2348_v36 = vadd.f32 %v2303_v19, %v2302_v40  ;;  %v2305_v12 = vmul.f32 %v4105_v13, %v2261_v31  ;;  %v2456_v31 = vsub.s32 %v4196_v18, %v3909_v58 }
 0x3eb   :  { %2349 = vadd.xlane.f32.xlu0 %v2348_v36  ;;  %v2351_v7 = vadd.f32 %v2305_v12, %v2304_v50  ;;  %v2486_v50 = vadd.s32 4294967256, %v4196_v18  ;;  %v2475_v12 = vsub.s32 %v2472_v33, %v3909_v58 }
 0x3ed   :  { %2352 = vadd.xlane.f32.xlu1 %v2351_v7 }
 0x440   :  { %v2308_v26 = vpop.xlane.xlu0 %2307 }
 0x441   :  { %v2356_v6 = vadd.f32 %v4184_v11, %v2308_v26 }
 0x442   :  { %v2311_v56 = vpop.xlane.xlu1 %2310 }
 0x443   :  { %v2357_v37 = vadd.f32 %v4184_v11, %v2311_v56  ;;  %v2372_v48 = vmul.f32 0.5, %v2356_v6 }
 0x445   :  { %v2373_v13 = vmul.f32 0.5, %v2357_v37 }
 0x447   :  { %3347 = vtanh.f32 %v2373_v13 }
 0x448   :  { %v2314_v63 = vpop.xlane.xlu0 %2313 }
 0x449   :  { %v2358_v60 = vadd.f32 %v4184_v11, %v2314_v63 }
 0x44a   :  { %v2317_v55 = vpop.xlane.xlu1 %2316 }
 0x44b   :  { %v2359_v38 = vadd.f32 %v4184_v11, %v2317_v55  ;;  %v2374_v39 = vmul.f32 0.5, %v2358_v60  ;;  %v2482_v55 = vsub.s32 %v2479_v8, %v3909_v58 }
 0x44d   :  { %v2375_v57 = vmul.f32 0.5, %v2359_v38  ;;  %3349 = vtanh.f32 %v2374_v39  ;;  %v2489_v38 = vsub.s32 %v2486_v50, %v3909_v58  ;;  %v2493_v39 = vadd.s32 4294967248, %v4196_v18 }
 0x44e   :  { %3351 = vtanh.f32 %v2372_v48 }
 0x44f   :  { %3353 = vtanh.f32 %v2375_v57  ;;  %v2507_v57 = vadd.s32 4294967232, %v4196_v18 }
 0x450   :  { %v2320_v2 = vpop.xlane.xlu0 %2319 }
 0x451   :  { %v2360_v14 = vadd.f32 %v4184_v11, %v2320_v2  ;;  %v3348_v44 = vpop.eup %3347 }
 0x452   :  { %v2323_v24 = vpop.xlane.xlu1 %2322  ;;  %v2405_v28 = vmul.f32 0.5, %v3348_v44 }
 0x453   :  { %v2361_v27 = vadd.f32 %v4184_v11, %v2323_v24  ;;  %v2376_v51 = vmul.f32 0.5, %v2360_v14 }
 0x454   :  { %v2421_v62 = vadd.f32 0.5, %v2405_v28 }
 0x455   :  { %v2377_v54 = vmul.f32 0.5, %v2361_v27  ;;  %3355 = vtanh.f32 %v2376_v51 }
 0x456   :  { %v2462_v7 = vrot.slane %v2421_v62, %v2461_v1 }
 0x457   :  { %3357 = vtanh.f32 %v2377_v54  ;;  %v3350_v43 = vpop.eup %3349 }
 0x458   :  { %v2326_v5 = vpop.xlane.xlu0 %2325  ;;  %v3352_v9 = vpop.eup %3351  ;;  %v2406_v53 = vmul.f32 0.5, %v3350_v43  ;;  %v2514_v43 = vadd.s32 4294967224, %v4196_v18 }
 0x459   :  { %v2362_v59 = vadd.f32 %v4184_v11, %v2326_v5  ;;  %v3354_v4 = vpop.eup %3353  ;;  %v2404_v61 = vmul.f32 0.5, %v3352_v9  ;;  %v2500_v5 = vadd.s32 4294967240, %v4196_v18 }
 0x45a   :  { %v2329_v49 = vpop.xlane.xlu1 %2328  ;;  %v2407_v34 = vmul.f32 0.5, %v3354_v4  ;;  %v2422_v47 = vadd.f32 0.5, %v2406_v53  ;;  %v2510_v4 = vsub.s32 %v2507_v57, %v3909_v58 }
 0x45b   :  { %v2363_v10 = vadd.f32 %v4184_v11, %v2329_v49  ;;  %v2378_v23 = vmul.f32 0.5, %v2362_v59  ;;  %v2420_v19 = vadd.f32 0.5, %v2404_v61  ;;  %v2503_v20 = vsub.s32 %v2500_v5, %v3909_v58 }
 0x45c   :  { %v2423_v26 = vadd.f32 0.5, %v2407_v34  ;;  %v2469_v60 = vrot.slane %v2422_v47, %v2468_v41  ;;  %v2535_v47 = vadd.s32 4294967200, %v4196_v18 }
 0x45d   :  { %v2379_v16 = vmul.f32 0.5, %v2363_v10  ;;  %3359 = vtanh.f32 %v2378_v23  ;;  %v2457_v13 = vrot.slane %v2420_v19, %v2456_v31 }
 0x45e   :  { %v2476_v59 = vrot.slane %v2423_v26, %v2475_v12  ;;  %v2538_v26 = vsub.s32 %v2535_v47, %v3909_v58 }
 0x45f   :  { %3361 = vtanh.f32 %v2379_v16  ;;  %v3356_v46 = vpop.eup %3355  ;;  %v2464_v49 = vsel %vm2463_vm0, %v2462_v7, %v2457_v13  ;;  %v2496_v16 = vsub.s32 %v2493_v39, %v3909_v58 }
 0x460   :  { %v2332_v0 = vpop.xlane.xlu0 %2331  ;;  %v2408_v15 = vmul.f32 0.5, %v3356_v46 }
 0x461   :  { %v2364_v52 = vadd.f32 %v4184_v11, %v2332_v0  ;;  %v3358_v30 = vpop.eup %3357  ;;  %v2471_v0 = vsel %vm2470_vm1, %v2469_v60, %v2464_v49  ;;  %v2556_v49 = vadd.s32 4294967176, %v4196_v18 }
 0x462   :  { %v2335_v42 = vpop.xlane.xlu1 %2334  ;;  %v2409_v56 = vmul.f32 0.5, %v3358_v30  ;;  %v2424_v6 = vadd.f32 0.5, %v2408_v15  ;;  %v2478_v3 = vsel %vm2477_vm2, %v2476_v59, %v2471_v0  ;;  %v2528_v30 = vadd.s32 4294967208, %v4196_v18 }
 0x463   :  { %v2365_v32 = vadd.f32 %v4184_v11, %v2335_v42  ;;  %v2380_v35 = vmul.f32 0.5, %v2364_v52 }
 0x464   :  { %v2425_v54 = vadd.f32 0.5, %v2409_v56  ;;  %v2483_v23 = vrot.slane %v2424_v6, %v2482_v55  ;;  %v2542_v6 = vadd.s32 4294967192, %v4196_v18 }
 0x465   :  { %v2381_v25 = vmul.f32 0.5, %v2365_v32  ;;  %3363 = vtanh.f32 %v2380_v35 }
 0x466   :  { %v2490_v9 = vrot.slane %v2425_v54, %v2489_v38  ;;  %v2545_v5 = vsub.s32 %v2542_v6, %v3909_v58 }
 0x467   :  { %3365 = vtanh.f32 %v2381_v25  ;;  %v3360_v36 = vpop.eup %3359 }
 0x468   :  { %v2338_v22 = vpop.xlane.xlu0 %2337  ;;  %v2410_v14 = vmul.f32 0.5, %v3360_v36 }
 0x469   :  { %v2366_v17 = vadd.f32 %v4184_v11, %v2338_v22  ;;  %v3362_v37 = vpop.eup %3361  ;;  %v2485_v22 = vsel %vm2484_vm3, %v2483_v23, %v2478_v3 }
 0x46a   :  { %v2341_v29 = vpop.xlane.xlu1 %2340  ;;  %v2411_v10 = vmul.f32 0.5, %v3362_v37  ;;  %v2426_v32 = vadd.f32 0.5, %v2410_v14  ;;  %v2492_v34 = vsel %vm2491_vm4, %v2490_v9, %v2485_v22  ;;  %v2549_v14 = vadd.s32 4294967184, %v4196_v18 }
 0x46b   :  { %v2382_v21 = vmul.f32 0.5, %v2366_v17  ;;  %v2367_v45 = vadd.f32 %v4184_v11, %v2341_v29  ;;  %v2521_v29 = vadd.s32 4294967216, %v4196_v18 }
 0x46c   :  { %v2427_v28 = vadd.f32 0.5, %v2411_v10  ;;  %v2497_v61 = vrot.slane %v2426_v32, %v2496_v16  ;;  %v2552_v54 = vsub.s32 %v2549_v14, %v3909_v58  ;;  %v2559_v16 = vsub.s32 %v2556_v49, %v3909_v58 }
 0x46d   :  { %3367 = vtanh.f32 %v2382_v21  ;;  %v2383_v40 = vmul.f32 0.5, %v2367_v45  ;;  %v2517_v21 = vsub.s32 %v2514_v43, %v3909_v58  ;;  %v2524_v36 = vsub.s32 %v2521_v29, %v3909_v58 }
 0x46e   :  { %v2504_v8 = vrot.slane %v2427_v28, %v2503_v20  ;;  %v2499_v19 = vsel %vm2498_vm5, %v2497_v61, %v2492_v34 }
 0x46f   :  { %3369 = vtanh.f32 %v2383_v40  ;;  %v3364_v48 = vpop.eup %3363 }
 0x470   :  { %v2344_v63 = vpop.xlane.xlu0 %2343  ;;  %v2412_v44 = vmul.f32 0.5, %v3364_v48  ;;  %v2506_v37 = vsel %vm2505_vm6, %v2504_v8, %v2499_v19 }
 0x471   :  { %v2368_v2 = vadd.f32 %v4184_v11, %v2344_v63  ;;  %v3366_v42 = vpop.eup %3365 }
 0x472   :  { %v2347_v24 = vpop.xlane.xlu1 %2346  ;;  %v2413_v53 = vmul.f32 0.5, %v3366_v42  ;;  %v2428_v1 = vadd.f32 0.5, %v2412_v44 }
 0x473   :  { %v2384_v27 = vmul.f32 0.5, %v2368_v2  ;;  %v2369_v51 = vadd.f32 %v4184_v11, %v2347_v24 }
 0x474   :  { %v2429_v15 = vadd.f32 0.5, %v2413_v53  ;;  %v2511_v50 = vrot.slane %v2428_v1, %v2510_v4 }
 0x475   :  { %3371 = vtanh.f32 %v2384_v27  ;;  %v2385_v52 = vmul.f32 0.5, %v2369_v51 }
 0x476   :  { %v2518_v60 = vrot.slane %v2429_v15, %v2517_v21  ;;  %v2513_v2 = vsel %vm2512_vm7, %v2511_v50, %v2506_v37 }
 0x477   :  { %v3368_v35 = vpop.eup %3367  ;;  %3373 = vtanh.f32 %v2385_v52 }
 0x478   :  { %v2350_v25 = vpop.xlane.xlu0 %2349  ;;  %v2414_v41 = vmul.f32 0.5, %v3368_v35  ;;  %v2520_v24 = vsel %vm2519_vm8, %v2518_v60, %v2513_v2 }
 0x479   :  { %v2370_v17 = vadd.f32 %v4184_v11, %v2350_v25  ;;  %v3370_v46 = vpop.eup %3369 }
 0x47a   :  { %v2353_v33 = vpop.xlane.xlu1 %2352  ;;  %v2415_v40 = vmul.f32 0.5, %v3370_v46  ;;  %v2430_v12 = vadd.f32 0.5, %v2414_v41 }
 0x47b   :  { %v2386_v45 = vmul.f32 0.5, %v2370_v17  ;;  %v2371_v62 = vadd.f32 %v4184_v11, %v2353_v33  ;;  %v2531_v11 = vsub.s32 %v2528_v30, %v3909_v58 }
 0x47c   :  { %v2431_v55 = vadd.f32 0.5, %v2415_v40  ;;  %v2525_v13 = vrot.slane %v2430_v12, %v2524_v36 }
 0x47d   :  { %3375 = vtanh.f32 %v2386_v45  ;;  %v2387_v31 = vmul.f32 0.5, %v2371_v62 }
 0x47e   :  { %v2532_v48 = vrot.slane %v2431_v55, %v2531_v11  ;;  %v2527_v27 = vsel %vm2526_vm9, %v2525_v13, %v2520_v24 }
 0x47f   :  { %v3372_v7 = vpop.eup %3371  ;;  %3377 = vtanh.f32 %v2387_v31 }
 0x480   :  { %v2416_v56 = vmul.f32 0.5, %v3372_v7  ;;  %v2534_v23 = vsel %vm2533_vm10, %v2532_v48, %v2527_v27 }
 0x481   :  { %v3374_v63 = vpop.eup %3373 }
 0x482   :  { %v2432_v38 = vadd.f32 0.5, %v2416_v56  ;;  %v2417_v39 = vmul.f32 0.5, %v3374_v63 }
 0x484   :  { %v2433_v57 = vadd.f32 0.5, %v2417_v39  ;;  %v2539_v51 = vrot.slane %v2432_v38, %v2538_v26 }
 0x486   :  { %v2546_v52 = vrot.slane %v2433_v57, %v2545_v5  ;;  %v2541_v44 = vsel %vm2540_vm11, %v2539_v51, %v2534_v23 }
 0x487   :  { %v3376_v59 = vpop.eup %3375 }
 0x488   :  { %v2418_v10 = vmul.f32 0.5, %v3376_v59  ;;  %v2548_v18 = vsel %vm2547_vm12, %v2546_v52, %v2541_v44 }
 0x489   :  { %v3378_v0 = vpop.eup %3377 }
 0x48a   :  { %v2434_v42 = vadd.f32 0.5, %v2418_v10  ;;  %v2419_v32 = vmul.f32 0.5, %v3378_v0 }
 0x48c   :  { %v2553_v35 = vrot.slane %v2434_v42, %v2552_v54  ;;  %v2435_v43 = vadd.f32 0.5, %v2419_v32 }
 0x48e   :  { %v2560_v3 = vrot.slane %v2435_v43, %v2559_v16  ;;  %v2555_v9 = vsel %vm2554_vm13, %v2553_v35, %v2548_v18 }
 0x490   :  { %v2562_v20 = vsel %vm2561_vm14, %v2560_v3, %v2555_v9 }
 0x491   :  { %2564 = vst [vmem:[#allocation12] sm:$0x1] %v2562_v20 }
 0x492   :  { %3478 = shalt.err (!%p3475_p8)
}
 0x493   :  { %s3479_s13 = scalar_lea.hbm %s4265_s10, 16 }
 0x494   :  { %p3480_p9 = scmp.ne.s32.totalorder %s4265_s10, %s3479_s13  ;;  %p3483_p10 = scmp.lt.u32.totalorder %s3479_s13, %s4265_s10 }
 0x496   :  { %p3485_p11 = pnand %p3483_p10, %p3480_p9 }
 0x498   :  { %3488 = shalt.err (!%p3485_p11)
}
 0x499   :  { %2574 = dma.vmem_to_hbm [thread:$0]  %s2572_s16, 16, %s4265_s10, [#allocation6]  }
 0x49a   :  { %3495 = dma.done.wait [#allocation6], 16  }
 0x49b   :  { %3496 = vsyncadd [#allocation6], 4294967280 }
 0x49c   :  { %2578 = vsyncpa [#allocation5], 1 }
 0x49d   :  { %2579 = vsyncpa [#allocation8], 1 }
 0x49e   :  { %2580 = vsyncpa [#allocation11], 1 }
 0x49f   :  { %2581 = vsyncpa [#allocation6], 1 }

</bundles_post_ra>
